<compile_context>
chip_gen: v6e
topology: v6e:2x2x1
jax: 0.10.0
libtpu: 0.0.40
codegen_flags: <defaults>
</compile_context>

<pallas_src>
import functools
import math

import jax
import jax.numpy as jnp
from jax.experimental import pallas as pl
from jax.experimental.pallas import tpu as pltpu


def _round_up(n, m):
    return ((n + m - 1) // m) * m


# ---------------------------- fused Pallas kernel ----------------------------

def _fused_caption_kernel(img_ref, q_ref, qkeep_ref,
                          wbb_ref, bbb_ref, wfp_ref, bfp_ref, pos_ref,
                          w1_ref, b1_ref, w2_ref, b2_ref, w3_ref, b3_ref,
                          o_ref, *, batch, hw, seq):
    f32 = jnp.float32
    bf16 = jnp.bfloat16

    # --- backbone stand-in: stride-2 subsampled pixels -> 1x1 conv + ReLU ---
    # Batch folded into M: (B*HW, Cp) @ (Cp, NCp).
    x = img_ref[...]                                               # bf16 (B*HW, Cp)
    feat = jnp.dot(x, wbb_ref[...], preferred_element_type=f32) + bbb_ref[...]
    feat = jnp.maximum(feat, 0.0)                                  # (B*HW, NCp) f32

    # --- feature_projection: 1x1 Conv2d(num_channels -> hidden_dim) ---
    proj = (jnp.dot(feat.astype(bf16), wfp_ref[...],
                    preferred_element_type=f32) + bfp_ref[...])    # (B*HW, Dp) f32

    # --- transformer stand-in: masked cross-attention (captions -> image) ---
    proj_b = proj.reshape(batch, hw, proj.shape[-1])               # (B, HW, Dp)
    k = (proj_b + pos_ref[...]).astype(bf16)                       # pos broadcast over batch
    v = proj_b.astype(bf16)
    q = q_ref[...]                                                 # bf16 (B, S, Dp); 1/sqrt(D) pre-folded
    scores = jnp.einsum('bqd,bkd->bqk', q, k,
                        preferred_element_type=f32)                # (B, S, HW)
    # TODO(synk): when the real feature extractor supplies a non-trivial src_mask,
    # re-add an additive key-pad bias input here (it is statically zero today).
    scores = scores - jnp.max(scores, axis=-1, keepdims=True)
    p = jnp.exp(scores)
    inv_denom = pl.reciprocal(jnp.sum(p, axis=-1, keepdims=True), approx=True)
    p = p * inv_denom
    attended = jnp.einsum('bqk,bkd->bqd', p.astype(bf16), v,
                          preferred_element_type=f32)              # (B, S, Dp) f32
    # Zero padded caption rows (stand-in for tgt_key_padding_mask handling).
    attended = attended.reshape(batch * seq, attended.shape[-1]) * qkeep_ref[...]

    # --- output head: MultiLayerPerceptron(hidden, 512, vocab, num_layers=3) ---
    h = jnp.dot(attended.astype(bf16), w1_ref[...],
                preferred_element_type=f32) + b1_ref[...]
    h = jnp.maximum(h, 0.0)
    h = jnp.dot(h.astype(bf16), w2_ref[...],
                preferred_element_type=f32) + b2_ref[...]
    h = jnp.maximum(h, 0.0)
    y = jnp.dot(h.astype(bf16), w3_ref[...],
                preferred_element_type=f32) + b3_ref[...]
    o_ref[...] = y                                                 # lane-dense (B*S, 128) f32 store


def fused_forward_pallas(packed, img2d, q, qkeep):
    B, S, _ = q.shape
    HW = packed["hw"]
    VP = packed["w3"].shape[1]
    vmem = pl.BlockSpec(memory_space=pltpu.MemorySpace.VMEM)       # whole array resident in VMEM

    kernel = functools.partial(_fused_caption_kernel, batch=B, hw=HW, seq=S)
    # ~0.9 MiB of resident bf16 weights + tiny activations: far below every
    # generation's scoped-VMEM default, so no explicit vmem_limit_bytes needed.
    # TODO(synk): once the real backbone/transformer sizes land, tile HW with a
    # flash-style accumulator and set vmem_limit_bytes (v7x: 64 MiB physical).
    return pl.pallas_call(
        kernel,
        out_shape=jax.ShapeDtypeStruct((B * S, VP), jnp.float32),
        in_specs=[vmem] * 14,
        out_specs=vmem,
    )(img2d, q, qkeep,
      packed["wbb"], packed["bbb"], packed["wfp"], packed["bfp"], packed["pos"],
      packed["w1"], packed["b1"], packed["w2"], packed["b2"],
      packed["w3"], packed["b3"])


# ---------------------------- params (logical + packed) ----------------------------

def init_params(key, in_channels=3, num_channels=4, hidden_dim=32, vocab_size=48):
    ks = jax.random.split(key, 6)

    def dense(k, fan_in, fan_out, scale=0.05):
        return (scale * jax.random.normal(k, (fan_in, fan_out), jnp.float32),
                jnp.zeros((fan_out,), jnp.float32))

    # TODO(synk): the real feature_extractor / transformer are injected modules;
    # these params back deterministic stand-ins (stride-2 1x1 conv backbone and a
    # single masked cross-attention).
    return {
        "backbone_conv": dense(ks[0], in_channels, num_channels),
        # nn.Conv2d(num_channels, hidden_dim, kernel_size=1)
        "feature_projection": dense(ks[1], num_channels, hidden_dim),
        "caption_embed": 0.05 * jax.random.normal(ks[2], (vocab_size, hidden_dim),
                                                  jnp.float32),
        # MultiLayerPerceptron(hidden_dim, 512, vocab_size, num_layers=3)
        "mlp": (dense(ks[3], hidden_dim, 512),
                dense(ks[4], 512, 512),
                dense(ks[5], 512, vocab_size)),
    }


def pack_params(params, image_hw=(16, 16)):
    """Zero-pad weights to MXU/lane-friendly shapes, cast matmul weights to bf16,
    fold the 1/sqrt(D) attention scale into the caption-embedding table, and
    precompute the positional encoding once (bf16)."""
    wbb, bbb = params["backbone_conv"]
    wfp, bfp = params["feature_projection"]
    (w1, b1), (w2, b2), (w3, b3) = params["mlp"]

    cin, nc = wbb.shape
    d = wfp.shape[1]
    hid = w1.shape[1]
    vocab = w3.shape[1]

    cin_pad = _round_up(cin, 8)
    nc_pad = _round_up(nc, 128)
    d_pad = _round_up(d, 128)
    hid_pad = _round_up(hid, 128)
    v_pad = _round_up(vocab, 128)

    def pad_w(w, rows, cols):
        return jnp.pad(w, ((0, rows - w.shape[0]),
                           (0, cols - w.shape[1]))).astype(jnp.bfloat16)

    def pad_b(b, cols):
        return jnp.pad(b, (0, cols - b.shape[0])).reshape(1, cols).astype(jnp.float32)

    # fold the 1/sqrt(D) attention scale into the caption-embedding table (bf16).
    embed = params["caption_embed"] * (1.0 / math.sqrt(d))
    embed = jnp.pad(embed, ((0, 0), (0, d_pad - d))).astype(jnp.bfloat16)

    # deterministic sinusoidal positional encoding, computed once at pack time.
    hp, wp = image_hw[0] // 2, image_hw[1] // 2     # stand-in backbone stride-2
    hw = hp * wp
    pos_idx = jnp.arange(hw, dtype=jnp.float32)[:, None]
    dim_idx = jnp.arange(d, dtype=jnp.float32)[None, :]
    pos = jnp.sin(pos_idx / (10000.0 ** (dim_idx / d)))
    pos = jnp.pad(pos, ((0, 0), (0, d_pad - d))).astype(jnp.bfloat16)

    return {
        "hidden_dim": d, "vocab_size": vocab, "hw": hw,
        "cin_pad": cin_pad, "d_pad": d_pad,
        "embed": embed, "pos": pos,
        "wbb": pad_w(wbb, cin_pad, nc_pad), "bbb": pad_b(bbb, nc_pad),
        "wfp": pad_w(wfp, nc_pad, d_pad), "bfp": pad_b(bfp, d_pad),
        "w1": pad_w(w1, d_pad, hid_pad), "b1": pad_b(b1, hid_pad),
        "w2": pad_w(w2, hid_pad, hid_pad), "b2": pad_b(b2, hid_pad),
        "w3": pad_w(w3, hid_pad, v_pad), "b3": pad_b(b3, v_pad),
    }


# ---------------------------- forward (wrapper glue) ----------------------------

def caption_generator_forward(packed, images, captions, masks):
    B, C, H, W = images.shape
    Hp, Wp = H // 2, W // 2
    HW = Hp * Wp
    S = captions.shape[1]
    assert HW == packed["hw"], "pack_params image_hw must match the input images"

    # backbone stand-in input prep: NCHW -> NHWC, stride-2 subsample, pad channels,
    # fold batch into rows, pre-cast bf16 for the MXU.
    # TODO(synk): at real image sizes express the stride-2 subsample / layout in the
    # kernel DMA (strided pl.ds or Element index_map) instead of wrapper ops.
    x = jnp.transpose(images, (0, 2, 3, 1))[:, ::2, ::2, :]
    img = jnp.pad(x.reshape(B * HW, C),
                  ((0, 0), (0, packed["cin_pad"] - C))).astype(jnp.bfloat16)

    # features[-1].decompose(): the stand-in extractor produces no padded pixels,
    # so src_mask is statically all-False and the additive key-pad bias is elided.
    src_mask = jnp.zeros((B, HW), jnp.bool_)
    assert src_mask is not None, "Mask is required for Transformer."

    # query keep-mask: zero the attended output of padded caption positions.
    # TODO(synk): PyTorch TransformerDecoder does not zero padded-query outputs;
    # masked-token logits here are MLP(0) by design of this stand-in.
    qkeep = (1.0 - masks.astype(jnp.float32)).reshape(B * S, 1)

    # caption token embedding (gather stays in XLA; 1/sqrt(D) scale pre-folded, bf16).
    q = jnp.take(packed["embed"], captions, axis=0)                # (B, S, D_pad) bf16

    out = fused_forward_pallas(packed, img, q, qkeep)              # (B*S, V_pad)
    out = out.reshape(B, S, -1)
    return out[:, :, :packed["vocab_size"]]                        # (B, S, vocab_size)


if __name__ == "__main__":
    key = jax.random.PRNGKey(0)
    k_img, k_cap, k_par = jax.random.split(key, 3)

    B, C_in, H, W = 2, 3, 16, 16
    S, vocab_size = 8, 48

    images = jax.random.normal(k_img, (B, C_in, H, W), jnp.float32)     # NCHW, as PyTorch
    captions = jax.random.randint(k_cap, (B, S), 0, vocab_size, jnp.int32)
    masks = jnp.zeros((B, S), jnp.bool_).at[:, S - 2:].set(True)        # last 2 tokens padded

    params = init_params(k_par, in_channels=C_in, num_channels=4,
                         hidden_dim=32, vocab_size=vocab_size)
    packed = pack_params(params, image_hw=(H, W))

    out = caption_generator_forward(packed, images, captions, masks)
    out = jax.block_until_ready(out)

    assert out.shape == (B, S, vocab_size), out.shape
    assert bool(jnp.all(jnp.isfinite(out)))
    print("KERNEL_OK")
</pallas_src>

<mosaic_0001>
module attributes {stable_mosaic.version = 11 : i64} {
  func.func @_fused_caption_kernel(%arg0: memref<128x8xbf16, #tpu.memory_space<vmem>>, %arg1: memref<2x8x128xbf16, #tpu.memory_space<vmem>>, %arg2: memref<16x1xf32, #tpu.memory_space<vmem>>, %arg3: memref<8x128xbf16, #tpu.memory_space<vmem>>, %arg4: memref<1x128xf32, #tpu.memory_space<vmem>>, %arg5: memref<128x128xbf16, #tpu.memory_space<vmem>>, %arg6: memref<1x128xf32, #tpu.memory_space<vmem>>, %arg7: memref<64x128xbf16, #tpu.memory_space<vmem>>, %arg8: memref<128x512xbf16, #tpu.memory_space<vmem>>, %arg9: memref<1x512xf32, #tpu.memory_space<vmem>>, %arg10: memref<512x512xbf16, #tpu.memory_space<vmem>>, %arg11: memref<1x512xf32, #tpu.memory_space<vmem>>, %arg12: memref<512x128xbf16, #tpu.memory_space<vmem>>, %arg13: memref<1x128xf32, #tpu.memory_space<vmem>>, %arg14: memref<16x128xf32, #tpu.memory_space<vmem>>) attributes {dimension_semantics = [], scalar_prefetch = 0 : i64, scratch_operands = 0 : i64, tpu.core_type = #tpu.core_type<tc>} {
    %c0 = arith.constant 0 : index
    %c0_0 = arith.constant 0 : index
    %0 = vector.load %arg0[%c0, %c0_0] : memref<128x8xbf16, #tpu.memory_space<vmem>>, vector<128x8xbf16>
    %c0_1 = arith.constant 0 : index
    %c0_2 = arith.constant 0 : index
    %1 = vector.load %arg3[%c0_1, %c0_2] : memref<8x128xbf16, #tpu.memory_space<vmem>>, vector<8x128xbf16>
    %cst = arith.constant dense<0.000000e+00> : vector<128x128xf32>
    %2 = tpu.matmul %0, %1, %cst {dimension_numbers = #tpu.dot_dimension_numbers<[1], [0], [0], [1], [0, 0, 1, 1], [], []>} : vector<128x8xbf16>, vector<8x128xbf16>, vector<128x128xf32> -> vector<128x128xf32>
    %c0_3 = arith.constant 0 : index
    %c0_4 = arith.constant 0 : index
    %3 = vector.load %arg4[%c0_3, %c0_4] : memref<1x128xf32, #tpu.memory_space<vmem>>, vector<1x128xf32>
    %4 = vector.broadcast %3 : vector<1x128xf32> to vector<128x128xf32>
    %5 = arith.addf %2, %4 : vector<128x128xf32>
    %cst_5 = arith.constant 0.000000e+00 : f32
    %6 = vector.broadcast %cst_5 : f32 to vector<128x128xf32>
    %7 = arith.maximumf %5, %6 : vector<128x128xf32>
    %8 = arith.truncf %7 : vector<128x128xf32> to vector<128x128xbf16>
    %c0_6 = arith.constant 0 : index
    %c0_7 = arith.constant 0 : index
    %9 = vector.load %arg5[%c0_6, %c0_7] : memref<128x128xbf16, #tpu.memory_space<vmem>>, vector<128x128xbf16>
    %cst_8 = arith.constant dense<0.000000e+00> : vector<128x128xf32>
    %10 = tpu.matmul %8, %9, %cst_8 {dimension_numbers = #tpu.dot_dimension_numbers<[1], [0], [0], [1], [0, 0, 1, 1], [], []>} : vector<128x128xbf16>, vector<128x128xbf16>, vector<128x128xf32> -> vector<128x128xf32>
    %c0_9 = arith.constant 0 : index
    %c0_10 = arith.constant 0 : index
    %11 = vector.load %arg6[%c0_9, %c0_10] : memref<1x128xf32, #tpu.memory_space<vmem>>, vector<1x128xf32>
    %12 = vector.broadcast %11 : vector<1x128xf32> to vector<128x128xf32>
    %13 = arith.addf %10, %12 : vector<128x128xf32>
    %14 = vector.shape_cast %13 : vector<128x128xf32> to vector<2x64x128xf32>
    %c0_11 = arith.constant 0 : index
    %c0_12 = arith.constant 0 : index
    %15 = vector.load %arg7[%c0_11, %c0_12] : memref<64x128xbf16, #tpu.memory_space<vmem>>, vector<64x128xbf16>
    %16 = arith.extf %15 : vector<64x128xbf16> to vector<64x128xf32>
    %17 = vector.shape_cast %16 : vector<64x128xf32> to vector<1x64x128xf32>
    %18 = vector.broadcast %17 : vector<1x64x128xf32> to vector<2x64x128xf32>
    %19 = arith.addf %14, %18 : vector<2x64x128xf32>
    %20 = arith.truncf %19 : vector<2x64x128xf32> to vector<2x64x128xbf16>
    %21 = arith.truncf %14 : vector<2x64x128xf32> to vector<2x64x128xbf16>
    %c0_13 = arith.constant 0 : index
    %c0_14 = arith.constant 0 : index
    %c0_15 = arith.constant 0 : index
    %22 = vector.load %arg1[%c0_13, %c0_14, %c0_15] : memref<2x8x128xbf16, #tpu.memory_space<vmem>>, vector<2x8x128xbf16>
    "tpu.trace_start"() <{level = 10 : i32, message = "bqd,bkd->bqk"}> : () -> ()
    %cst_16 = arith.constant dense<0.000000e+00> : vector<2x8x64xf32>
    %23 = tpu.matmul %22, %20, %cst_16 {dimension_numbers = #tpu.dot_dimension_numbers<[2], [2], [1], [1], [0, 0, 0, 1, 1, 1], [0], [0]>} : vector<2x8x128xbf16>, vector<2x64x128xbf16>, vector<2x8x64xf32> -> vector<2x8x64xf32>
    "tpu.trace_stop"() : () -> ()
    %cst_17 = arith.constant dense<0xFF800000> : vector<2x8xf32>
    %24 = vector.multi_reduction <maximumf>, %23, %cst_17 [2] : vector<2x8x64xf32> to vector<2x8xf32>
    %25 = vector.shape_cast %24 : vector<2x8xf32> to vector<2x8x1xf32>
    %26 = vector.broadcast %25 : vector<2x8x1xf32> to vector<2x8x64xf32>
    %27 = arith.subf %23, %26 : vector<2x8x64xf32>
    %28 = math.exp %27 : vector<2x8x64xf32>
    %cst_18 = arith.constant dense<0.000000e+00> : vector<2x8xf32>
    %29 = vector.multi_reduction <add>, %28, %cst_18 [2] : vector<2x8x64xf32> to vector<2x8xf32>
    %30 = vector.shape_cast %29 : vector<2x8xf32> to vector<2x8x1xf32>
    %31 = tpu.reciprocal %30 {approx = true} : vector<2x8x1xf32> -> vector<2x8x1xf32>
    %32 = vector.broadcast %31 : vector<2x8x1xf32> to vector<2x8x64xf32>
    %33 = arith.mulf %28, %32 : vector<2x8x64xf32>
    %34 = arith.truncf %33 : vector<2x8x64xf32> to vector<2x8x64xbf16>
    "tpu.trace_start"() <{level = 10 : i32, message = "bqk,bkd->bqd"}> : () -> ()
    %cst_19 = arith.constant dense<0.000000e+00> : vector<2x8x128xf32>
    %35 = tpu.matmul %34, %21, %cst_19 {dimension_numbers = #tpu.dot_dimension_numbers<[2], [1], [1], [2], [0, 0, 0, 1, 1, 2], [0], [0]>} : vector<2x8x64xbf16>, vector<2x64x128xbf16>, vector<2x8x128xf32> -> vector<2x8x128xf32>
    "tpu.trace_stop"() : () -> ()
    %36 = vector.shape_cast %35 : vector<2x8x128xf32> to vector<16x128xf32>
    %c0_20 = arith.constant 0 : index
    %c0_21 = arith.constant 0 : index
    %37 = vector.load %arg2[%c0_20, %c0_21] : memref<16x1xf32, #tpu.memory_space<vmem>>, vector<16x1xf32>
    %38 = vector.broadcast %37 : vector<16x1xf32> to vector<16x128xf32>
    %39 = arith.mulf %36, %38 : vector<16x128xf32>
    %40 = arith.truncf %39 : vector<16x128xf32> to vector<16x128xbf16>
    %c0_22 = arith.constant 0 : index
    %c0_23 = arith.constant 0 : index
    %41 = vector.load %arg8[%c0_22, %c0_23] : memref<128x512xbf16, #tpu.memory_space<vmem>>, vector<128x512xbf16>
    %cst_24 = arith.constant dense<0.000000e+00> : vector<16x512xf32>
    %42 = tpu.matmul %40, %41, %cst_24 {dimension_numbers = #tpu.dot_dimension_numbers<[1], [0], [0], [1], [0, 0, 1, 1], [], []>} : vector<16x128xbf16>, vector<128x512xbf16>, vector<16x512xf32> -> vector<16x512xf32>
    %c0_25 = arith.constant 0 : index
    %c0_26 = arith.constant 0 : index
    %43 = vector.load %arg9[%c0_25, %c0_26] : memref<1x512xf32, #tpu.memory_space<vmem>>, vector<1x512xf32>
    %44 = vector.broadcast %43 : vector<1x512xf32> to vector<16x512xf32>
    %45 = arith.addf %42, %44 : vector<16x512xf32>
    %cst_27 = arith.constant 0.000000e+00 : f32
    %46 = vector.broadcast %cst_27 : f32 to vector<16x512xf32>
    %47 = arith.maximumf %45, %46 : vector<16x512xf32>
    %48 = arith.truncf %47 : vector<16x512xf32> to vector<16x512xbf16>
    %c0_28 = arith.constant 0 : index
    %c0_29 = arith.constant 0 : index
    %49 = vector.load %arg10[%c0_28, %c0_29] : memref<512x512xbf16, #tpu.memory_space<vmem>>, vector<512x512xbf16>
    %cst_30 = arith.constant dense<0.000000e+00> : vector<16x512xf32>
    %50 = tpu.matmul %48, %49, %cst_30 {dimension_numbers = #tpu.dot_dimension_numbers<[1], [0], [0], [1], [0, 0, 1, 1], [], []>} : vector<16x512xbf16>, vector<512x512xbf16>, vector<16x512xf32> -> vector<16x512xf32>
    %c0_31 = arith.constant 0 : index
    %c0_32 = arith.constant 0 : index
    %51 = vector.load %arg11[%c0_31, %c0_32] : memref<1x512xf32, #tpu.memory_space<vmem>>, vector<1x512xf32>
    %52 = vector.broadcast %51 : vector<1x512xf32> to vector<16x512xf32>
    %53 = arith.addf %50, %52 : vector<16x512xf32>
    %cst_33 = arith.constant 0.000000e+00 : f32
    %54 = vector.broadcast %cst_33 : f32 to vector<16x512xf32>
    %55 = arith.maximumf %53, %54 : vector<16x512xf32>
    %56 = arith.truncf %55 : vector<16x512xf32> to vector<16x512xbf16>
    %c0_34 = arith.constant 0 : index
    %c0_35 = arith.constant 0 : index
    %57 = vector.load %arg12[%c0_34, %c0_35] : memref<512x128xbf16, #tpu.memory_space<vmem>>, vector<512x128xbf16>
    %cst_36 = arith.constant dense<0.000000e+00> : vector<16x128xf32>
    %58 = tpu.matmul %56, %57, %cst_36 {dimension_numbers = #tpu.dot_dimension_numbers<[1], [0], [0], [1], [0, 0, 1, 1], [], []>} : vector<16x512xbf16>, vector<512x128xbf16>, vector<16x128xf32> -> vector<16x128xf32>
    %c0_37 = arith.constant 0 : index
    %c0_38 = arith.constant 0 : index
    %59 = vector.load %arg13[%c0_37, %c0_38] : memref<1x128xf32, #tpu.memory_space<vmem>>, vector<1x128xf32>
    %60 = vector.broadcast %59 : vector<1x128xf32> to vector<16x128xf32>
    %61 = arith.addf %58, %60 : vector<16x128xf32>
    %c0_39 = arith.constant 0 : index
    %c0_40 = arith.constant 0 : index
    %62 = vector.load %arg14[%c0_39, %c0_40] : memref<16x128xf32, #tpu.memory_space<vmem>>, vector<16x128xf32>
    tpu.vector_store %arg14[%c0_39, %c0_40], %61 {strides = array<i32>} : memref<16x128xf32, #tpu.memory_space<vmem>>, vector<16x128xf32>,
    return
  }
}

</mosaic_0001>

<bundles_post_ra>
// kernel: tpu_custom_call.1
= control target key start
LH: loop header
LB: loop body
LE: loop exit
PB: predicated region body
PF: predicated region fallthrough
CT: control target
= control target key end

     0   :  { %19 = vsyncpa [#allocation3], 0  ;;  %s3640_s0 = inlined_call_operand.vmem [shape: bf16[128,8], index: 0, kind: input, shape index: {}]   ;;  %s3641_s1 = inlined_call_operand.hbm [shape: bf16[2,8,128], index: 1, kind: input, shape index: {}]   ;;  %s3642_s2 = inlined_call_operand.vmem [shape: f32[16,1], index: 2, kind: input, shape index: {}]   ;;  %s3643_s3 = inlined_call_operand.hbm [shape: bf16[8,128], index: 3, kind: input, shape index: {}]   ;;  %s3644_s4 = inlined_call_operand.vmem [shape: f32[1,128], index: 4, kind: input, shape index: {}]   ;;  %s3645_s5 = inlined_call_operand.vmem [shape: bf16[128,128], index: 5, kind: input, shape index: {}]   ;;  %s3646_s6 = inlined_call_operand.hbm [shape: f32[1,128], index: 6, kind: input, shape index: {}]   ;;  %s3647_s7 = inlined_call_operand.vmem [shape: bf16[64,128], index: 7, kind: input, shape index: {}]   ;;  %s3648_s8 = inlined_call_operand.hbm [shape: bf16[128,512], index: 8, kind: input, shape index: {}]   ;;  %s3649_s9 = inlined_call_operand.vmem [shape: f32[1,512], index: 9, kind: input, shape index: {}]   ;;  %s3650_s10 = inlined_call_operand.hbm [shape: bf16[512,512], index: 10, kind: input, shape index: {}]   ;;  %s3651_s11 = inlined_call_operand.vmem [shape: f32[1,512], index: 11, kind: input, shape index: {}]   ;;  %s3652_s12 = inlined_call_operand.hbm [shape: bf16[512,128], index: 12, kind: input, shape index: {}]   ;;  %s3653_s13 = inlined_call_operand.vmem [shape: f32[1,128], index: 13, kind: input, shape index: {}]   ;;  %s3654_s14 = inlined_call_operand.hbm [shape: f32[16,128], index: 14, kind: output, shape index: {}]  }
   0x1   :  { %20 = vsyncpa [#allocation6], 0 }
   0x2   :  { %21 = vsyncpa [#allocation9], 0 }
   0x3   :  { %22 = vsyncpa [#allocation12], 0 }
   0x4   :  { %23 = vsyncpa [#allocation4], 0  ;;  %s3310_s29 = smov [#allocation5]   ;;  %s3311_s15 = smov [#allocation8]  }
   0x5   :  { %s46_s30 = sshll.u32 %s3310_s29, 4  ;;  %s71_s16 = sshll.u32 %s3311_s15, 4  ;;  %s47_s30 = int_to_ptr.vmem [resolvable:$true] %s46_s30  ;;  %s72_s16 = int_to_ptr.vmem [resolvable:$true] %s71_s16 }
   0x6   :  { %s3168_s17 = scalar_lea.vmem %s47_s30, 64  ;;  %p3173_p1 = scmp.lt.s32.totalorder %s47_s30, %s47_s30 }
   0x7   :  { %p3169_p0 = scmp.ne.s32.totalorder %s47_s30, %s3168_s17  ;;  %p3174_p2 = scmp.lt.s32.totalorder %s3168_s17, %s3168_s17 }
   0x9   :  { %p3175_p3 = por %p3174_p2, %p3173_p1 }
   0xb   :  { %p3176_p4 = pnand %p3175_p3, %p3169_p0 }
   0xd   :  { %3179 = shalt.err (!%p3176_p4)
}
   0xe   :  { %49 = dma.hbm_to_vmem [thread:$0]  %s3643_s3, 64, %s47_s30, [#allocation6]  }
   0xf   :  { %s3188_s20 = scalar_lea.vmem %s72_s16, 4096  ;;  %p3193_p6 = scmp.lt.s32.totalorder %s72_s16, %s72_s16 }
  0x10   :  { %p3189_p5 = scmp.ne.s32.totalorder %s72_s16, %s3188_s20  ;;  %p3194_p7 = scmp.lt.s32.totalorder %s3188_s20, %s3188_s20 }
  0x12   :  { %p3195_p8 = por %p3194_p7, %p3193_p6 }
  0x14   :  { %p3196_p9 = pnand %p3195_p8, %p3189_p5 }
  0x16   :  { %3199 = shalt.err (!%p3196_p9)
}
  0x17   :  { %s3312_s21 = smov 256   ;;  %s3313_s22 = smov 16  }
  0x18   :  { %77 = dma.hbm_to_vmem [thread:$0]  %s3648_s8, 4096, %s72_s16, [#allocation9], %s3312_s21, %s3312_s21, %s3313_s22  }
  0x19   :  { %s3314_s25 = smov [#allocation2]  }
  0x1a   :  { %s31_s26 = sshll.u32 %s3314_s25, 4  ;;  %s32_s26 = int_to_ptr.vmem [resolvable:$true] %s31_s26 }
  0x1b   :  { %s3208_s3 = scalar_lea.vmem %s32_s26, 128  ;;  %p3213_p11 = scmp.lt.s32.totalorder %s32_s26, %s32_s26 }
  0x1c   :  { %p3209_p10 = scmp.ne.s32.totalorder %s32_s26, %s3208_s3  ;;  %p3214_p12 = scmp.lt.s32.totalorder %s3208_s3, %s3208_s3 }
  0x1e   :  { %p3215_p13 = por %p3214_p12, %p3213_p11 }
  0x20   :  { %p3216_p0 = pnand %p3215_p13, %p3209_p10 }
  0x22   :  { %3219 = shalt.err (!%p3216_p0)
}
  0x23   :  { %s3315_s27 = smov 64   ;;  %s3316_s28 = smov 4  }
  0x24   :  { %37 = dma.hbm_to_vmem [thread:$0]  %s3641_s1, 128, %s32_s26, [#allocation3], %s3315_s27, %s3315_s27, %s3316_s28  }
  0x25   :  { %s3317_s8 = smov [#allocation7]   ;;  %s3318_s16 = smov [#allocation10]  }
  0x26   :  { %s60_s15 = sshll.u32 %s3317_s8, 4  ;;  %s85_s17 = sshll.u32 %s3318_s16, 4  ;;  %s61_s15 = int_to_ptr.vmem [resolvable:$true] %s60_s15  ;;  %s86_s17 = int_to_ptr.vmem [resolvable:$true] %s85_s17 }
  0x27   :  { %s3228_s18 = scalar_lea.vmem %s61_s15, 16  ;;  %s3232_s19 = scalar_lea.vmem %s61_s15, 32 }
  0x28   :  { %p3229_p1 = scmp.ne.s32.totalorder %s61_s15, %s3228_s18  ;;  %p3233_p2 = scmp.lt.s32.totalorder %s61_s15, %s61_s15 }
  0x29   :  { %p3234_p3 = scmp.lt.s32.totalorder %s3232_s19, %s3228_s18 }
  0x2b   :  { %p3235_p4 = por %p3234_p3, %p3233_p2 }
  0x2d   :  { %p3236_p5 = pnand %p3235_p4, %p3229_p1 }
  0x2f   :  { %3239 = shalt.err (!%p3236_p5)
}
  0x30   :  { %63 = dma.hbm_to_vmem [thread:$0]  %s3646_s6, 16, %s61_s15, [#allocation6]  }
  0x31   :  { %s3248_s24 = scalar_lea.vmem %s86_s17, 16384  ;;  %p3253_p7 = scmp.lt.s32.totalorder %s86_s17, %s86_s17 }
  0x32   :  { %p3249_p6 = scmp.ne.s32.totalorder %s86_s17, %s3248_s24  ;;  %p3254_p8 = scmp.lt.s32.totalorder %s3248_s24, %s3248_s24 }
  0x34   :  { %p3255_p9 = por %p3254_p8, %p3253_p7 }
  0x36   :  { %p3256_p10 = pnand %p3255_p9, %p3249_p6 }
  0x38   :  { %3259 = shalt.err (!%p3256_p10)
}
  0x39   :  { %91 = dma.hbm_to_vmem [thread:$0]  %s3650_s10, 16384, %s86_s17, [#allocation9], %s3312_s21, %s3312_s21, %s3313_s22  }
  0x3a   :  { %s3319_s26 = smov [#allocation11]  }
  0x3b   :  { %s99_s3 = sshll.u32 %s3319_s26, 4  ;;  %s100_s3 = int_to_ptr.vmem [resolvable:$true] %s99_s3 }
  0x3c   :  { %s3268_s29 = scalar_lea.vmem %s100_s3, 4096  ;;  %p3273_p12 = scmp.lt.s32.totalorder %s100_s3, %s100_s3 }
  0x3d   :  { %p3269_p11 = scmp.ne.s32.totalorder %s100_s3, %s3268_s29  ;;  %p3274_p13 = scmp.lt.s32.totalorder %s3268_s29, %s3268_s29 }
  0x3f   :  { %p3275_p0 = por %p3274_p13, %p3273_p12 }
  0x41   :  { %p3276_p1 = pnand %p3275_p0, %p3269_p11 }
  0x43   :  { %3279 = shalt.err (!%p3276_p1)
}
  0x44   :  { %105 = dma.hbm_to_vmem [thread:$0]  %s3652_s12, 4096, %s100_s3, [#allocation12], %s3315_s27, %s3315_s27, %s3316_s28  }
  0x45   :  { %3300 = dma.done.wait [#allocation3], 128  }
  0x46   :  { %3301 = vsyncadd [#allocation3], 4294967168 }
  0x47   :  { %3302 = dma.done.wait [#allocation6], 80  }
  0x48   :  { %3303 = vsyncadd [#allocation6], 4294967216 }
  0x49   :  { %3304 = dma.done.wait [#allocation9], 20480  }
  0x4a   :  { %3305 = vsyncadd [#allocation9], 4294946816 }
  0x4b   :  { %3306 = dma.done.wait [#allocation12], 4096  }
  0x4c   :  { %3307 = vsyncadd [#allocation12], 4294963200  ;;  %vm216_vm0 = vcmask 1043456   ;;  %vm191_vm1 = vcmask 64512   ;;  %v143_v0 = vld [vmem:[#allocation5] sm:$0xf] }
  0x4d   :  { %2845 = vmatprep.subr.msk.bf16.mxu0 %vm216_vm0, %v143_v0  ;;  %v218_v1 = vsel %vm216_vm0, %v143_v0, 0  ;;  %v2864_v2 = vld [vmem:[%s3640_s0] sm:$0xff]   ;;  %v2865_v3 = vld [vmem:[%s3640_s0 + $0x8] sm:$0xff]   ;;  %v2866_v4 = vld [vmem:[%s3640_s0 + $0x10] sm:$0xff]   ;;  %vm3321_vm2 = vmmov 0   ;;  %vm639_vm3 = vcmask 523264  }
  0x4e   :  { %2748 = vmatpush3.bf16.msra.mxu0 %v218_v1  ;;  %2749 = vmatprep.mubr.msk.bf16.mxu0 %vm191_vm1, %v2864_v2  ;;  %v2867_v5 = vld [vmem:[%s3640_s0 + $0x18] sm:$0xff]   ;;  %v2868_v6 = vld [vmem:[%s3640_s0 + $0x20] sm:$0xff]   ;;  %v2873_v8 = vld [vmem:[%s3645_s5 + $0x30] sm:$0xff]   ;;  %s3323_s21 = smov [#allocation13]  }
  0x4f   :  { %v2872_v7 = vld [vmem:[%s3645_s5 + $0x38] sm:$0xff]   ;;  %v2874_v9 = vld [vmem:[%s3645_s5 + $0x28] sm:$0xff]   ;;  %v2875_v11 = vld [vmem:[%s3645_s5 + $0x20] sm:$0xff]   ;;  %s2403_s22 = sshll.u32 %s3323_s21, 4  ;;  %s2404_s22 = int_to_ptr.vmem [resolvable:$true] %s2403_s22 }
  0x50   :  { %2765 = vmatprep.subr.bf16.mxu1 %v2872_v7  ;;  %v2869_v10 = vld [vmem:[%s3640_s0 + $0x28] sm:$0xff]   ;;  %v2870_v12 = vld [vmem:[%s3640_s0 + $0x30] sm:$0xff]   ;;  %v2876_v13 = vld [vmem:[%s3645_s5 + $0x18] sm:$0xff]   ;;  %s3280_s12 = scalar_lea.vmem %s2404_s22, 256  ;;  %p3285_p3 = scmp.lt.s32.totalorder %s2404_s22, %s2404_s22 }
  0x51   :  { %2750 = vmatmul.mubr.msk.bf16.vlgmr.msra.gmra.mxu0 %vm191_vm1, %v2865_v3  ;;  %2766 = vmatpush3.bf16.msra.mxu1 %v2872_v7  ;;  %v2871_v14 = vld [vmem:[%s3640_s0 + $0x38] sm:$0xff]   ;;  %v2877_v15 = vld [vmem:[%s3645_s5 + $0x10] sm:$0xff]   ;;  %v2878_v16 = vld [vmem:[%s3645_s5 + $0x8] sm:$0xff]   ;;  %p3281_p2 = scmp.ne.s32.totalorder %s2404_s22, %s3280_s12  ;;  %p3286_p4 = scmp.lt.s32.totalorder %s3280_s12, %s3280_s12 }
  0x52   :  { %2753 = vmatprep.mubr.msk.bf16.mxu0 %vm191_vm1, %v2866_v4  ;;  %2767 = vmatprep.subr.bf16.mxu1 %v2873_v8  ;;  %v2879_v17 = vld [vmem:[%s3645_s5] sm:$0xff]  }
  0x53   :  { %v2418_v20 = vld [vmem:[%s3644_s4] ss:$0 sm:$0xff]  ;;  %p3287_p5 = por %p3286_p4, %p3285_p3 }
  0x55   :  { %2768 = vmatpush3.bf16.msra.mxu1 %v2873_v8  ;;  %p3288_p6 = pnand %p3287_p5, %p3281_p2 }
  0x56   :  { %2769 = vmatprep.subr.bf16.mxu1 %v2874_v9 }
  0x59   :  { %2754 = vmatmul.mubr.msk.bf16.gmra.mxu0 %vm191_vm1, %v2867_v5  ;;  %2770 = vmatpush3.bf16.msra.mxu1 %v2874_v9 }
  0x5a   :  { %2757 = vmatprep.mubr.msk.bf16.mxu0 %vm191_vm1, %v2868_v6  ;;  %2771 = vmatprep.subr.bf16.mxu1 %v2875_v11 }
  0x5d   :  { %2772 = vmatpush3.bf16.msra.mxu1 %v2875_v11  ;;  %v3320_v11 = vmov 0.0  }
  0x5e   :  { %2773 = vmatprep.subr.bf16.mxu1 %v2876_v13  ;;  %2797 = vmatprep.subr.bf16.mxu0 %v3320_v11 }
  0x61   :  { %2758 = vmatmul.mubr.msk.bf16.gmra.mxu0 %vm191_vm1, %v2869_v10  ;;  %2774 = vmatpush3.bf16.msra.mxu1 %v2876_v13 }
  0x62   :  { %2761 = vmatprep.mubr.msk.bf16.mxu0 %vm191_vm1, %v2870_v12  ;;  %2775 = vmatprep.subr.bf16.mxu1 %v2877_v15 }
  0x65   :  { %2776 = vmatpush3.bf16.msra.mxu1 %v2877_v15 }
  0x66   :  { %2777 = vmatprep.subr.bf16.mxu1 %v2878_v16 }
  0x69   :  { %2762 = vmatmul.mubr.msk.bf16.gmra.mxu0 %vm191_vm1, %v2871_v14  ;;  %2778 = vmatpush3.bf16.msra.mxu1 %v2878_v16 }
  0x6a   :  { %2779 = vmatprep.subr.bf16.mxu1 %v2879_v17  ;;  %2805 = vmatprep.mubr.msk.bf16.mxu0 %vm3321_vm2, %v3320_v11 }
  0x6d   :  { %2780 = vmatpush3.bf16.msra.mxu1 %v2879_v17  ;;  %v2657_v17 = vld [vmem:[%s3647_s7 + $0x18] sm:$0xff]  }
  0x6e   :  { %2809 = vmatprep.subr.bf16.mxu1 %v3320_v11 }
 0x111   :  { %v2751_v18 = vpop.f32.mrf.mxu0 }
 0x112   :  { %v263_v24 = vadd.f32 %v2751_v18, %v2418_v20  ;;  %v2435_v18 = vld [vmem:[#allocation7] ss:$0 sm:$0xff] }
 0x113   :  { %v254_v19 = vpop.f32.mrf.mxu0 }
 0x114   :  { %v255_v22 = vadd.f32 %v2418_v20, %v254_v19  ;;  %v319_v31 = vmax.f32 %v263_v24, 0.0 }
 0x115   :  { %v2752_v21 = vpop.f32.mrf.mxu0 }
 0x116   :  { %v266_v23 = vadd.f32 %v2752_v21, %v2418_v20  ;;  %v317_v29 = vmax.f32 %v255_v22, 0.0  ;;  %v2653_v21 = vunpack.c.l.bf16 %v2657_v17  ;;  %v2654_v22 = vunpack.c.h.bf16 %v2657_v17 }
 0x117   :  { %v257_v25 = vpop.f32.mrf.mxu0 }
 0x118   :  { %v258_v26 = vadd.f32 %v2418_v20, %v257_v25  ;;  %v320_v27 = vmax.f32 %v266_v23, 0.0 }
 0x119   :  { %v2755_v28 = vpop.f32.mrf.mxu0 }
 0x11a   :  { %v318_v30 = vmax.f32 %v258_v26, 0.0  ;;  %v334_v34 = vpack.c.bf16 %v320_v27, %v319_v31  ;;  %v279_v38 = vadd.f32 %v2755_v28, %v2418_v20  ;;  %v2656_v28 = vld [vmem:[%s3647_s7 + $0x10] sm:$0xff]  }
 0x11b   :  { %v270_v32 = vpop.f32.mrf.mxu0 }
 0x11c   :  { %v333_v33 = vpack.c.bf16 %v318_v30, %v317_v29  ;;  %v271_v36 = vadd.f32 %v2418_v20, %v270_v32  ;;  %v323_v45 = vmax.f32 %v279_v38, 0.0  ;;  %v2650_v32 = vunpack.c.h.bf16 %v2656_v28 }
 0x11d   :  { %v2756_v35 = vpop.f32.mrf.mxu0 }
 0x11e   :  { %v282_v37 = vadd.f32 %v2756_v35, %v2418_v20  ;;  %2781 = vmatprep.mubr.bf16.mxu1 %v333_v33  ;;  %v321_v43 = vmax.f32 %v271_v36, 0.0  ;;  %v2649_v35 = vunpack.c.l.bf16 %v2656_v28 }
 0x11f   :  { %v273_v39 = vpop.f32.mrf.mxu0  ;;  %2782 = vmatmul.mubr.bf16.vlgmr.msra.gmra.mxu1 %v334_v34 }
 0x120   :  { %v274_v40 = vadd.f32 %v2418_v20, %v273_v39  ;;  %v324_v41 = vmax.f32 %v282_v37, 0.0 }
 0x121   :  { %v2759_v42 = vpop.f32.mrf.mxu0 }
 0x122   :  { %v322_v44 = vmax.f32 %v274_v40, 0.0  ;;  %v336_v48 = vpack.c.bf16 %v324_v41, %v323_v45  ;;  %v295_v52 = vadd.f32 %v2759_v42, %v2418_v20  ;;  %v2655_v41 = vld [vmem:[%s3647_s7 + $0x8] sm:$0xff]  }
 0x123   :  { %v286_v46 = vpop.f32.mrf.mxu0 }
 0x124   :  { %v335_v47 = vpack.c.bf16 %v322_v44, %v321_v43  ;;  %v287_v50 = vadd.f32 %v2418_v20, %v286_v46  ;;  %v327_v59 = vmax.f32 %v295_v52, 0.0  ;;  %v2645_v52 = vunpack.c.l.bf16 %v2655_v41 }
 0x125   :  { %v2760_v49 = vpop.f32.mrf.mxu0 }
 0x126   :  { %v298_v51 = vadd.f32 %v2760_v49, %v2418_v20  ;;  %2785 = vmatprep.mubr.bf16.mxu1 %v335_v47  ;;  %v325_v57 = vmax.f32 %v287_v50, 0.0 }
 0x127   :  { %v289_v53 = vpop.f32.mrf.mxu0  ;;  %2786 = vmatmul.mubr.bf16.gmra.mxu1 %v336_v48  ;;  %v2646_v48 = vunpack.c.h.bf16 %v2655_v41 }
 0x128   :  { %v290_v54 = vadd.f32 %v2418_v20, %v289_v53  ;;  %v328_v55 = vmax.f32 %v298_v51, 0.0 }
 0x129   :  { %v2763_v56 = vpop.f32.mrf.mxu0 }
 0x12a   :  { %v326_v58 = vmax.f32 %v290_v54, 0.0  ;;  %v338_v62 = vpack.c.bf16 %v328_v55, %v327_v59  ;;  %v311_v2 = vadd.f32 %v2763_v56, %v2418_v20 }
 0x12b   :  { %v302_v60 = vpop.f32.mrf.mxu0 }
 0x12c   :  { %v337_v61 = vpack.c.bf16 %v326_v58, %v325_v57  ;;  %v303_v0 = vadd.f32 %v2418_v20, %v302_v60  ;;  %v331_v8 = vmax.f32 %v311_v2, 0.0 }
 0x12d   :  { %v2764_v63 = vpop.f32.mrf.mxu0 }
 0x12e   :  { %v314_v1 = vadd.f32 %v2764_v63, %v2418_v20  ;;  %2789 = vmatprep.mubr.bf16.mxu1 %v337_v61  ;;  %v329_v6 = vmax.f32 %v303_v0, 0.0  ;;  %v2640_v61 = vld [vmem:[%s3647_s7] sm:$0xff]  }
 0x12f   :  { %v305_v3 = vpop.f32.mrf.mxu0  ;;  %2790 = vmatmul.mubr.bf16.gmra.mxu1 %v338_v62  ;;  %v2642_v2 = vunpack.c.h.bf16 %v2640_v61 }
 0x130   :  { %v306_v4 = vadd.f32 %v2418_v20, %v305_v3  ;;  %v332_v5 = vmax.f32 %v314_v1, 0.0 }
 0x132   :  { %v330_v7 = vmax.f32 %v306_v4, 0.0  ;;  %v340_v10 = vpack.c.bf16 %v332_v5, %v331_v8  ;;  %v2641_v8 = vunpack.c.l.bf16 %v2640_v61  ;;  %v2888_v61 = vld [vmem:[#allocation8 + $0xc4] ss:$16 sps:$4 sm:$0xff]  }
 0x134   :  { %v339_v9 = vpack.c.bf16 %v330_v7, %v329_v6 }
 0x136   :  { %2793 = vmatprep.mubr.bf16.mxu1 %v339_v9 }
 0x137   :  { %2794 = vmatmul.mubr.bf16.gmra.mxu1 %v340_v10 }
 0x138   :  { %2817 = vmatprep.mubr.msk.bf16.mxu1 %vm3321_vm2, %v3320_v11 }
 0x1df   :  { %v2783_v12 = vpop.f32.mrf.mxu1 }
 0x1e0   :  { %v455_v51 = vadd.f32 %v2783_v12, %v2435_v18 }
 0x1e1   :  { %v446_v13 = vpop.f32.mrf.mxu1 }
 0x1e2   :  { %v527_v58 = vadd.f32 %v2645_v52, %v455_v51  ;;  %v447_v7 = vadd.f32 %v2435_v18, %v446_v13 }
 0x1e3   :  { %v2784_v14 = vpop.f32.mrf.mxu1 }
 0x1e4   :  { %v458_v47 = vadd.f32 %v2784_v14, %v2435_v18  ;;  %v525_v12 = vadd.f32 %v2641_v8, %v447_v7 }
 0x1e5   :  { %v449_v15 = vpop.f32.mrf.mxu1 }
 0x1e6   :  { %v528_v56 = vadd.f32 %v2646_v48, %v458_v47  ;;  %v450_v4 = vadd.f32 %v2435_v18, %v449_v15 }
 0x1e7   :  { %v2787_v16 = vpop.f32.mrf.mxu1 }
 0x1e8   :  { %v3499_v20 = vadd.f32 %v2787_v16, %v2435_v18  ;;  %v542_v3 = vpack.c.bf16 %v528_v56, %v527_v58  ;;  %v526_v9 = vadd.f32 %v2642_v2, %v450_v4  ;;  %v751_v56 = vld [vmem:[%s3642_s2 + $0x8] sm:$0xff] }
 0x1e9   :  { %v462_v19 = vpop.f32.mrf.mxu1  ;;  %v2880_v58 = vld [vmem:[#allocation8 + $0xe0] ss:$16 sps:$4 sm:$0xff]  }
 0x1ea   :  { %v531_v26 = vadd.f32 %v2653_v21, %v3499_v20  ;;  %v3510_v34 = vadd.f32 %v2435_v18, %v462_v19  ;;  %v541_v16 = vpack.c.bf16 %v526_v9, %v525_v12 }
 0x1eb   :  { %v2788_v23 = vpop.f32.mrf.mxu1 }
 0x1ec   :  { %v3501_v24 = vadd.f32 %v2788_v23, %v2435_v18  ;;  %v529_v42 = vadd.f32 %v2649_v35, %v3510_v34 }
 0x1ed   :  { %v465_v25 = vpop.f32.mrf.mxu1 }
 0x1ee   :  { %v532_v27 = vadd.f32 %v2654_v22, %v3501_v24  ;;  %v3508_v31 = vadd.f32 %v2435_v18, %v465_v25  ;;  %v552_v19 = vpack.c.bf16 %v3501_v24, %v3499_v20  ;;  %v550_v20 = vpack.c.bf16 %v458_v47, %v455_v51 }
 0x1ef   :  { %v2791_v29 = vpop.f32.mrf.mxu1 }
 0x1f0   :  { %v544_v30 = vpack.c.bf16 %v532_v27, %v531_v26  ;;  %v530_v37 = vadd.f32 %v2650_v32, %v3508_v31  ;;  %v3514_v38 = vadd.f32 %v2791_v29, %v2435_v18  ;;  %v549_v26 = vpack.c.bf16 %v450_v4, %v447_v7  ;;  %v558_v27 = vld [vmem:[#allocation2 + $0x4] sm:$0xf] }
 0x1f1   :  { %v478_v33 = vpop.f32.mrf.mxu1 }
 0x1f2   :  { %2798 = vmatpush3.bf16.xpose.msra.mxu0 %v544_v30  ;;  %v3522_v43 = vadd.f32 %v2435_v18, %v478_v33  ;;  %v543_v49 = vpack.c.bf16 %v530_v37, %v529_v42  ;;  %v535_v17 = vadd.f32 %v2645_v52, %v3514_v38 }
 0x1f3   :  { %v2792_v36 = vpop.f32.mrf.mxu1  ;;  %2799 = vmatprep.subr.bf16.mxu0 %v3320_v11 }
 0x1f4   :  { %v3516_v39 = vadd.f32 %v2792_v36, %v2435_v18  ;;  %v533_v25 = vadd.f32 %v2641_v8, %v3522_v43 }
 0x1f5   :  { %v481_v40 = vpop.f32.mrf.mxu1 }
 0x1f6   :  { %v554_v44 = vpack.c.bf16 %v3516_v39, %v3514_v38  ;;  %v3526_v45 = vadd.f32 %v2435_v18, %v481_v40  ;;  %v536_v13 = vadd.f32 %v2646_v48, %v3516_v39  ;;  %v2897_v38 = vld [vmem:[#allocation8 + $0xac] ss:$16 sps:$4 sm:$0xff]   ;;  %v2900_v39 = vld [vmem:[#allocation8 + $0x84] ss:$16 sps:$4 sm:$0xff]  }
 0x1f7   :  { %v2795_v46 = vpop.f32.mrf.mxu1 }
 0x1f8   :  { %v553_v50 = vpack.c.bf16 %v3526_v45, %v3522_v43  ;;  %v3530_v53 = vadd.f32 %v2795_v46, %v2435_v18  ;;  %v534_v23 = vadd.f32 %v2642_v2, %v3526_v45  ;;  %v2894_v2 = vld [vmem:[#allocation8 + $0xa4] ss:$16 sps:$4 sm:$0xff]   ;;  %v2901_v43 = vld [vmem:[#allocation8 + $0x88] ss:$16 sps:$4 sm:$0xff]   ;;  %v2904_v45 = vld [vmem:[#allocation8 + $0x60] ss:$16 sps:$4 sm:$0xff]  }
 0x1f9   :  { %v494_v54 = vpop.f32.mrf.mxu1 }
 0x1fa   :  { %2800 = vmatpush3.bf16.xpose.msra.mxu0 %v543_v49  ;;  %v539_v59 = vadd.f32 %v2653_v21, %v3530_v53  ;;  %v3539_v62 = vadd.f32 %v2435_v18, %v494_v54  ;;  %v546_v21 = vpack.c.bf16 %v536_v13, %v535_v17  ;;  %v545_v24 = vpack.c.bf16 %v534_v23, %v533_v25  ;;  %v2910_v13 = vld [vmem:[#allocation8 + $0x40] ss:$16 sps:$4 sm:$0xff]   ;;  %v2915_v17 = vld [vmem:[#allocation8 + $0x4c] ss:$16 sps:$4 sm:$0xff]   ;;  %v2919_v23 = vld [vmem:[#allocation8 + $0x28] ss:$16 sps:$4 sm:$0xff]  }
 0x1fb   :  { %v2796_v55 = vpop.f32.mrf.mxu1  ;;  %2801 = vmatprep.subr.bf16.mxu0 %v3320_v11  ;;  %v2924_v25 = vld [vmem:[#allocation8 + $0x4] ss:$16 sps:$4 sm:$0xff]  }
 0x1fc   :  { %v3533_v57 = vadd.f32 %v2796_v55, %v2435_v18  ;;  %v537_v14 = vadd.f32 %v2649_v35, %v3539_v62  ;;  %v750_v55 = vld [vmem:[%s3642_s2] sm:$0xff] }
 0x1fd   :  { %v497_v60 = vpop.f32.mrf.mxu1 }
 0x1fe   :  { %v540_v63 = vadd.f32 %v2654_v22, %v3533_v57  ;;  %v556_v0 = vpack.c.bf16 %v3533_v57, %v3530_v53  ;;  %v3544_v1 = vadd.f32 %v2435_v18, %v497_v60  ;;  %v557_v18 = vld [vmem:[#allocation2] sm:$0xf]  ;;  %v551_v22 = vpack.c.bf16 %v3508_v31, %v3510_v34 }
 0x1ff   :  { %v2882_v60 = vld [vmem:[#allocation8 + $0xe4] ss:$16 sps:$4 sm:$0xff]  }
 0x200   :  { %v548_v5 = vpack.c.bf16 %v540_v63, %v539_v59  ;;  %v555_v6 = vpack.c.bf16 %v3544_v1, %v3539_v62  ;;  %v538_v10 = vadd.f32 %v2650_v32, %v3544_v1  ;;  %v3322_v59 = vmov 0   ;;  %v2886_v63 = vld [vmem:[#allocation8 + $0xc0] ss:$16 sps:$4 sm:$0xff]   ;;  %v2891_v62 = vld [vmem:[#allocation8 + $0xcc] ss:$16 sps:$4 sm:$0xff]  }
 0x201   :  { %2862 = vset.pattern.permute.xlu0 %v3322_v59  ;;  %2863 = vset.pattern.permute.xlu1 %v3322_v59  ;;  %v2889_v1 = vld [vmem:[#allocation8 + $0xc8] ss:$16 sps:$4 sm:$0xff]  }
 0x202   :  { %2802 = vmatpush3.bf16.xpose.msra.mxu0 %v542_v3  ;;  %2810 = vmatpush3.bf16.xpose.msra.mxu1 %v548_v5  ;;  %v547_v15 = vpack.c.bf16 %v538_v10, %v537_v14  ;;  %v2892_v3 = vld [vmem:[#allocation8 + $0xa0] ss:$16 sps:$4 sm:$0xff]   ;;  %v2885_v10 = vld [vmem:[#allocation8 + $0xec] ss:$16 sps:$4 sm:$0xff]   ;;  %v2907_v14 = vld [vmem:[#allocation8 + $0x68] ss:$16 sps:$4 sm:$0xff]  }
 0x203   :  { %2803 = vmatprep.subr.bf16.mxu0 %v3320_v11  ;;  %2811 = vmatprep.subr.bf16.mxu1 %v3320_v11 }
 0x20a   :  { %2804 = vmatpush3.bf16.xpose.msra.mxu0 %v541_v16  ;;  %2812 = vmatpush3.bf16.xpose.msra.mxu1 %v547_v15  ;;  %v2909_v16 = vld [vmem:[#allocation8 + $0x6c] ss:$16 sps:$4 sm:$0xff]   ;;  %v2912_v15 = vld [vmem:[#allocation8 + $0x44] ss:$16 sps:$4 sm:$0xff]  }
 0x20b   :  { %2813 = vmatprep.subr.bf16.mxu1 %v3320_v11  ;;  %2821 = vmatprep.subr.bf16.mxu0 %v3320_v11 }
 0x211   :  { %2806 = vmatmul.mubr.bf16.vlgmr.msra.gmra.mxu0 %v557_v18  ;;  %v2913_v18 = vld [vmem:[#allocation8 + $0x48] ss:$16 sps:$4 sm:$0xff]  }
 0x212   :  { %2814 = vmatpush3.bf16.xpose.msra.mxu1 %v546_v21  ;;  %2822 = vmatpush3.bf16.msra.mxu0 %v552_v19  ;;  %v2918_v19 = vld [vmem:[#allocation8 + $0x24] ss:$16 sps:$4 sm:$0xff]   ;;  %v2921_v21 = vld [vmem:[#allocation8 + $0x2c] ss:$16 sps:$4 sm:$0xff]  }
 0x213   :  { %2823 = vmatprep.subr.bf16.mxu0 %v3320_v11  ;;  %2815 = vmatprep.subr.bf16.mxu1 %v3320_v11 }
 0x214   :  { %2829 = vmatprep.mubr.msk.bf16.mxu0 %vm3321_vm2, %v3320_v11 }
 0x216   :  { %2824 = vmatpush3.bf16.msra.mxu0 %v551_v22  ;;  %v2916_v22 = vld [vmem:[#allocation8 + $0x20] ss:$16 sps:$4 sm:$0xff]  }
 0x217   :  { %2825 = vmatprep.subr.bf16.mxu0 %v3320_v11 }
 0x21a   :  { %2816 = vmatpush3.bf16.xpose.msra.mxu1 %v545_v24  ;;  %2826 = vmatpush3.bf16.msra.mxu0 %v550_v20  ;;  %v2927_v20 = vld [vmem:[#allocation8 + $0xc] ss:$16 sps:$4 sm:$0xff]   ;;  %v2922_v24 = vld [vmem:[#allocation8] ss:$16 sps:$4 sm:$0xff]  }
 0x21b   :  { %2827 = vmatprep.subr.bf16.mxu0 %v3320_v11  ;;  %979 = vmatprep.subr.bf16.mxu1 %v2882_v60  ;;  %v2948_v60 = vld [vmem:[#allocation10 + $0x84] ss:$16 sps:$4 sm:$0xff]  }
 0x21e   :  { %2828 = vmatpush3.bf16.msra.mxu0 %v549_v26  ;;  %v2925_v26 = vld [vmem:[#allocation8 + $0x8] ss:$16 sps:$4 sm:$0xff]  }
 0x21f   :  { %2833 = vmatprep.subr.bf16.mxu0 %v3320_v11 }
 0x221   :  { %2818 = vmatmul.mubr.bf16.vlgmr.msra.gmra.mxu1 %v558_v27  ;;  %v2930_v27 = vld [vmem:[#allocation10 + $0xe4] ss:$16 sps:$4 sm:$0xff]  }
 0x222   :  { %1011 = vmatprep.mubr.bf16.mxu1 %v3322_v59  ;;  %980 = vmatpush1.bf16.msra.mxu1 %v2880_v58  ;;  %v2940_v58 = vld [vmem:[#allocation10 + $0xa0] ss:$16 sps:$4 sm:$0xff]  }
 0x223   :  { %981 = vmatprep.subr.bf16.mxu1 %v2888_v61  ;;  %v2951_v61 = vld [vmem:[#allocation10 + $0x284] ss:$16 sps:$4 sm:$0xff]  }
 0x226   :  { %982 = vmatpush1.bf16.msra.mxu1 %v2886_v63  ;;  %v2946_v63 = vld [vmem:[#allocation10 + $0x80] ss:$16 sps:$4 sm:$0xff]  }
 0x227   :  { %983 = vmatprep.subr.bf16.mxu1 %v2894_v2  ;;  %v2949_v2 = vld [vmem:[#allocation10 + $0x280] ss:$16 sps:$4 sm:$0xff]  }
 0x22a   :  { %984 = vmatpush1.bf16.msra.mxu1 %v2892_v3  ;;  %v2954_v3 = vld [vmem:[#allocation10 + $0x64] ss:$16 sps:$4 sm:$0xff]  }
 0x22b   :  { %985 = vmatprep.subr.bf16.mxu1 %v2900_v39  ;;  %v2973_v39 = vld [vmem:[#allocation10 + $0x200] ss:$16 sps:$4 sm:$0xff]  }
 0x2d1   :  { %v593_v28 = vpop.f32.mrf.mxu0 }
 0x2d2   :  { %v640_v29 = vsel %vm639_vm3, %v593_v28, -inf }
 0x2d3   :  { %641 = vmax.xlane.f32.xlu0 %v640_v29  ;;  %v2807_v30 = vpop.f32.mrf.mxu0 }
 0x2d5   :  { %v596_v31 = vpop.f32.mrf.mxu0 }
 0x2d7   :  { %v2808_v32 = vpop.f32.mrf.mxu0 }
 0x2e1   :  { %v633_v33 = vpop.f32.mrf.mxu1 }
 0x2e2   :  { %v643_v34 = vsel %vm639_vm3, %v633_v33, -inf }
 0x2e3   :  { %v2819_v35 = vpop.f32.mrf.mxu1  ;;  %644 = vmax.xlane.f32.xlu0 %v643_v34 }
 0x2e5   :  { %v636_v36 = vpop.f32.mrf.mxu1 }
 0x2e7   :  { %v2820_v37 = vpop.f32.mrf.mxu1 }
 0x2f9   :  { %754 = vperm.xlu0 %2862, %v750_v55   ;;  %v2942_v55 = vld [vmem:[#allocation10 + $0xa4] ss:$16 sps:$4 sm:$0xff]  }
 0x35c   :  { %v642_v40 = vpop.xlane.xlu0 %641 }
 0x35d   :  { %v646_v41 = vsub.f32 %v593_v28, %v642_v40  ;;  %v2933_v28 = vld [vmem:[#allocation10 + $0x2e4] ss:$16 sps:$4 sm:$0xff]  }
 0x35f   :  { %v648_v42 = vmul.f32 1.442695, %v646_v41  ;;  %v2928_v41 = vld [vmem:[#allocation10 + $0xe0] ss:$16 sps:$4 sm:$0xff]  }
 0x361   :  { %3152 = vpow2.f32 %v648_v42  ;;  %v2931_v42 = vld [vmem:[#allocation10 + $0x2e0] ss:$16 sps:$4 sm:$0xff]  }
 0x36c   :  { %v645_v46 = vpop.xlane.xlu0 %644 }
 0x36d   :  { %v647_v47 = vsub.f32 %v633_v33, %v645_v46 }
 0x36e   :  { %v3153_v48 = vpop.eup %3152 }
 0x36f   :  { %v650_v49 = vmul.f32 1.442695, %v647_v47  ;;  %v652_v51 = vsel %vm639_vm3, %v3153_v48, 0.0  ;;  %v2936_v47 = vld [vmem:[#allocation10 + $0xc4] ss:$16 sps:$4 sm:$0xff]  }
 0x370   :  { %653 = vadd.xlane.f32.xlu1 %v652_v51 }
 0x371   :  { %3154 = vpow2.f32 %v650_v49 }
 0x374   :  { %v755_v33 = vpop.permute.xlu0 %754 }
 0x37e   :  { %v3155_v52 = vpop.eup %3154 }
 0x37f   :  { %v655_v54 = vsel %vm639_vm3, %v3155_v52, 0.0 }
 0x380   :  { %656 = vadd.xlane.f32.xlu1 %v655_v54  ;;  %v2937_v54 = vld [vmem:[#allocation10 + $0x2c0] ss:$16 sps:$4 sm:$0xff]  }
 0x391   :  { %759 = vperm.xlu1 %2863, %v751_v56   ;;  %v2945_v56 = vld [vmem:[#allocation10 + $0x2a4] ss:$16 sps:$4 sm:$0xff]  }
 0x3f9   :  { %v654_v4 = vpop.xlane.xlu1 %653 }
 0x3fa   :  { %3156 = vrcp.f32 %v654_v4  ;;  %v2957_v4 = vld [vmem:[#allocation10 + $0x264] ss:$16 sps:$4 sm:$0xff]  }
 0x407   :  { %v3157_v5 = vpop.eup %3156 }
 0x408   :  { %v660_v7 = vmul.f32 %v3157_v5, %v3153_v48  ;;  %v2939_v48 = vld [vmem:[#allocation10 + $0x2c4] ss:$16 sps:$4 sm:$0xff]   ;;  %v2952_v5 = vld [vmem:[#allocation10 + $0x60] ss:$16 sps:$4 sm:$0xff]  }
 0x409   :  { %v657_v8 = vpop.xlane.xlu1 %656 }
 0x40a   :  { %3158 = vrcp.f32 %v657_v8  ;;  %v662_v9 = vpack.c.bf16 %v660_v7, %v660_v7  ;;  %v2955_v7 = vld [vmem:[#allocation10 + $0x260] ss:$16 sps:$4 sm:$0xff]   ;;  %v2960_v8 = vld [vmem:[#allocation10 + $0x44] ss:$16 sps:$4 sm:$0xff]  }
 0x40c   :  { %2830 = vmatmul.mubr.msk.bf16.vlgmr.msra.gmra.mxu0 %vm639_vm3, %v662_v9  ;;  %v2963_v9 = vld [vmem:[#allocation10 + $0x244] ss:$16 sps:$4 sm:$0xff]  }
 0x40d   :  { %2834 = vmatpush3.bf16.msra.mxu0 %v556_v0  ;;  %2841 = vmatprep.mubr.msk.bf16.mxu0 %vm3321_vm2, %v3320_v11  ;;  %v2883_v0 = vld [vmem:[#allocation8 + $0xe8] ss:$16 sps:$4 sm:$0xff]   ;;  %v760_v34 = vpop.permute.xlu1 %759 }
 0x40e   :  { %2835 = vmatprep.subr.bf16.mxu0 %v3320_v11 }
 0x411   :  { %2836 = vmatpush3.bf16.msra.mxu0 %v555_v6  ;;  %v2898_v6 = vld [vmem:[#allocation8 + $0x80] ss:$16 sps:$4 sm:$0xff]  }
 0x412   :  { %2837 = vmatprep.subr.bf16.mxu0 %v3320_v11  ;;  %986 = vmatpush1.bf16.msra.mxu1 %v2898_v6  ;;  %v2981_v6 = vld [vmem:[#allocation10 + $0x3e4] ss:$16 sps:$4 sm:$0xff]  }
 0x415   :  { %2838 = vmatpush3.bf16.msra.mxu0 %v554_v44  ;;  %v2903_v44 = vld [vmem:[#allocation8 + $0x8c] ss:$16 sps:$4 sm:$0xff]  }
 0x416   :  { %2839 = vmatprep.subr.bf16.mxu0 %v3320_v11  ;;  %v2895_v11 = vld [vmem:[#allocation8 + $0xa8] ss:$16 sps:$4 sm:$0xff]  }
 0x417   :  { %v3159_v53 = vpop.eup %3158 }
 0x418   :  { %v661_v57 = vmul.f32 %v3159_v53, %v3155_v52  ;;  %v2934_v52 = vld [vmem:[#allocation10 + $0xc0] ss:$16 sps:$4 sm:$0xff]  }
 0x419   :  { %2840 = vmatpush3.bf16.msra.mxu0 %v553_v50  ;;  %v2906_v50 = vld [vmem:[#allocation8 + $0x64] ss:$16 sps:$4 sm:$0xff]   ;;  %v2961_v53 = vld [vmem:[#allocation10 + $0x240] ss:$16 sps:$4 sm:$0xff]  }
 0x41a   :  { %v663_v12 = vpack.c.bf16 %v661_v57, %v661_v57  ;;  %1022 = vmatprep.subr.bf16.mxu0 %v2885_v10  ;;  %987 = vmatprep.subr.bf16.mxu1 %v2906_v50  ;;  %v2958_v10 = vld [vmem:[#allocation10 + $0x40] ss:$16 sps:$4 sm:$0xff]   ;;  %v2966_v57 = vld [vmem:[#allocation10 + $0x24] ss:$16 sps:$4 sm:$0xff]  }
 0x41b   :  { %988 = vmatpush1.bf16.msra.mxu1 %v2904_v45  ;;  %v2979_v45 = vld [vmem:[#allocation10 + $0x3e0] ss:$16 sps:$4 sm:$0xff]   ;;  %v2984_v50 = vld [vmem:[#allocation10 + $0x1c4] ss:$16 sps:$4 sm:$0xff]  }
 0x41c   :  { %2842 = vmatmul.mubr.msk.bf16.vlgmr.msra.gmra.mxu0 %vm639_vm3, %v663_v12  ;;  %989 = vmatprep.subr.bf16.mxu1 %v2912_v15  ;;  %v2964_v12 = vld [vmem:[#allocation10 + $0x20] ss:$16 sps:$4 sm:$0xff]  }
 0x41d   :  { %1023 = vmatpush1.bf16.msra.mxu0 %v2883_v0  ;;  %1054 = vmatprep.mubr.bf16.mxu0 %v3322_v59  ;;  %v2943_v59 = vld [vmem:[#allocation10 + $0x2a0] ss:$16 sps:$4 sm:$0xff]   ;;  %v2969_v0 = vld [vmem:[#allocation10 + $0x224] ss:$16 sps:$4 sm:$0xff]  }
 0x41e   :  { %1024 = vmatprep.subr.bf16.mxu0 %v2891_v62  ;;  %v2967_v62 = vld [vmem:[#allocation10 + $0x220] ss:$16 sps:$4 sm:$0xff]  }
 0x41f   :  { %990 = vmatpush1.bf16.msra.mxu1 %v2910_v13  ;;  %v2985_v15 = vld [vmem:[#allocation10 + $0x3c0] ss:$16 sps:$4 sm:$0xff]   ;;  %v2990_v13 = vld [vmem:[#allocation10 + $0x1a4] ss:$16 sps:$4 sm:$0xff]  }
 0x420   :  { %991 = vmatprep.subr.bf16.mxu1 %v2918_v19  ;;  %v2991_v19 = vld [vmem:[#allocation10 + $0x3a0] ss:$16 sps:$4 sm:$0xff]  }
 0x421   :  { %1025 = vmatpush1.bf16.msra.mxu0 %v2889_v1  ;;  %v2972_v1 = vld [vmem:[#allocation10 + $0x4] ss:$16 sps:$4 sm:$0xff]  }
 0x422   :  { %1026 = vmatprep.subr.bf16.mxu0 %v2897_v38  ;;  %v2975_v38 = vld [vmem:[#allocation10 + $0x204] ss:$16 sps:$4 sm:$0xff]  }
 0x423   :  { %992 = vmatpush1.bf16.msra.mxu1 %v2916_v22  ;;  %v2999_v22 = vld [vmem:[#allocation10 + $0x384] ss:$16 sps:$4 sm:$0xff]  }
 0x424   :  { %993 = vmatprep.subr.bf16.mxu1 %v2924_v25  ;;  %v2997_v25 = vld [vmem:[#allocation10 + $0x380] ss:$16 sps:$4 sm:$0xff]  }
 0x425   :  { %1027 = vmatpush1.bf16.msra.mxu0 %v2895_v11  ;;  %v2970_v11 = vld [vmem:[#allocation10] ss:$16 sps:$4 sm:$0xff]  }
 0x426   :  { %1028 = vmatprep.subr.bf16.mxu0 %v2903_v44  ;;  %v2978_v44 = vld [vmem:[#allocation10 + $0x1e4] ss:$16 sps:$4 sm:$0xff]  }
 0x427   :  { %994 = vmatpush1.bf16.msra.mxu1 %v2922_v24  ;;  %v3005_v24 = vld [vmem:[#allocation10 + $0x364] ss:$16 sps:$4 sm:$0xff]  }
 0x428   :  { %1867 = vmatprep.subr.bf16.mxu1 %v2930_v27  ;;  %v3003_v27 = vld [vmem:[#allocation10 + $0x360] ss:$16 sps:$4 sm:$0xff]  }
 0x429   :  { %1029 = vmatpush1.bf16.msra.mxu0 %v2901_v43  ;;  %v2976_v43 = vld [vmem:[#allocation10 + $0x1e0] ss:$16 sps:$4 sm:$0xff]  }
 0x42a   :  { %1030 = vmatprep.subr.bf16.mxu0 %v2909_v16  ;;  %v2982_v16 = vld [vmem:[#allocation10 + $0x1c0] ss:$16 sps:$4 sm:$0xff]  }
 0x42d   :  { %1031 = vmatpush1.bf16.msra.mxu0 %v2907_v14  ;;  %v2987_v14 = vld [vmem:[#allocation10 + $0x3c4] ss:$16 sps:$4 sm:$0xff]  }
 0x42e   :  { %1032 = vmatprep.subr.bf16.mxu0 %v2915_v17  ;;  %v2993_v17 = vld [vmem:[#allocation10 + $0x3a4] ss:$16 sps:$4 sm:$0xff]  }
 0x431   :  { %1033 = vmatpush1.bf16.msra.mxu0 %v2913_v18  ;;  %v2988_v18 = vld [vmem:[#allocation10 + $0x1a0] ss:$16 sps:$4 sm:$0xff]  }
 0x432   :  { %1034 = vmatprep.subr.bf16.mxu0 %v2921_v21  ;;  %v2996_v21 = vld [vmem:[#allocation10 + $0x184] ss:$16 sps:$4 sm:$0xff]  }
 0x435   :  { %1035 = vmatpush1.bf16.msra.mxu0 %v2919_v23  ;;  %v2994_v23 = vld [vmem:[#allocation10 + $0x180] ss:$16 sps:$4 sm:$0xff]  }
 0x436   :  { %1036 = vmatprep.subr.bf16.mxu0 %v2927_v20  ;;  %v3002_v20 = vld [vmem:[#allocation10 + $0x164] ss:$16 sps:$4 sm:$0xff]  }
 0x439   :  { %1037 = vmatpush1.bf16.msra.mxu0 %v2925_v26  ;;  %v3000_v26 = vld [vmem:[#allocation10 + $0x160] ss:$16 sps:$4 sm:$0xff]  }
 0x43a   :  { %1910 = vmatprep.subr.bf16.mxu0 %v2933_v28  ;;  %v3008_v28 = vld [vmem:[#allocation10 + $0x144] ss:$16 sps:$4 sm:$0xff]  }
 0x4cc   :  { %v701_v29 = vpop.f32.mrf.mxu0 }
 0x4cd   :  { %v762_v36 = vmul.f32 %v755_v33, %v701_v29  ;;  %v3011_v29 = vld [vmem:[#allocation10 + $0x344] ss:$16 sps:$4 sm:$0xff]  }
 0x4ce   :  { %v2831_v30 = vpop.f32.mrf.mxu0  ;;  %v3017_v33 = vld [vmem:[#allocation10 + $0x324] ss:$16 sps:$4 sm:$0xff]  }
 0x4cf   :  { %v3006_v30 = vld [vmem:[#allocation10 + $0x140] ss:$16 sps:$4 sm:$0xff]  }
 0x4d0   :  { %v704_v31 = vpop.f32.mrf.mxu0 }
 0x4d1   :  { %v3009_v31 = vld [vmem:[#allocation10 + $0x340] ss:$16 sps:$4 sm:$0xff]  }
 0x4d2   :  { %v2832_v32 = vpop.f32.mrf.mxu0 }
 0x4d3   :  { %v3014_v32 = vld [vmem:[#allocation10 + $0x124] ss:$16 sps:$4 sm:$0xff]  }
 0x4dc   :  { %v744_v35 = vpop.f32.mrf.mxu0 }
 0x4dd   :  { %v763_v37 = vmul.f32 %v760_v34, %v744_v35  ;;  %v3012_v34 = vld [vmem:[#allocation10 + $0x120] ss:$16 sps:$4 sm:$0xff]  }
 0x4de   :  { %v2843_v40 = vpop.f32.mrf.mxu0  ;;  %v3015_v35 = vld [vmem:[#allocation10 + $0x320] ss:$16 sps:$4 sm:$0xff]  }
 0x4df   :  { %v764_v46 = vpack.c.bf16 %v763_v37, %v762_v36  ;;  %v3020_v36 = vld [vmem:[#allocation10 + $0x104] ss:$16 sps:$4 sm:$0xff]   ;;  %v3018_v40 = vld [vmem:[#allocation10 + $0x100] ss:$16 sps:$4 sm:$0xff]  }
 0x4e0   :  { %v747_v49 = vpop.f32.mrf.mxu0  ;;  %v3023_v37 = vld [vmem:[#allocation10 + $0x304] ss:$16 sps:$4 sm:$0xff]  }
 0x4e1   :  { %1012 = vmatmul.mubr.bf16.vlgmr.msra.gmra.mxu1 %v764_v46  ;;  %1055 = vmatmul.mubr.bf16.vlgmr.msra.gmra.mxu0 %v764_v46  ;;  %v3029_v46 = vld [vmem:[#allocation10 + $0x2ec] ss:$16 sps:$4 sm:$0xff]  }
 0x4e2   :  { %v2844_v51 = vpop.f32.mrf.mxu0  ;;  %1868 = vmatpush1.bf16.msra.mxu1 %v2928_v41  ;;  %1911 = vmatpush1.bf16.msra.mxu0 %v2931_v42  ;;  %v3021_v41 = vld [vmem:[#allocation10 + $0x300] ss:$16 sps:$4 sm:$0xff]   ;;  %v3026_v42 = vld [vmem:[#allocation10 + $0xec] ss:$16 sps:$4 sm:$0xff]  }
 0x4e3   :  { %1869 = vmatprep.subr.bf16.mxu1 %v2936_v47  ;;  %1912 = vmatprep.subr.bf16.mxu0 %v2939_v48  ;;  %v799_v47 = vlaneseq }
 0x4e5   :  { %v3598_v48 = vshrl.u32 %v799_v47, 7  ;;  %v3063_v47 = vld [vmem:[#allocation10 + $0x228] ss:$16 sps:$4 sm:$0xff]  }
 0x4e6   :  { %1870 = vmatpush1.bf16.msra.mxu1 %v2934_v52  ;;  %1913 = vmatpush1.bf16.msra.mxu0 %v2937_v54 }
 0x4e7   :  { %1871 = vmatprep.subr.bf16.mxu1 %v2942_v55  ;;  %1914 = vmatprep.subr.bf16.mxu0 %v2945_v56  ;;  %v805_v49 = vsub.s32 1, %v3598_v48  ;;  %v813_v51 = vsub.s32 3, %v3598_v48  ;;  %v801_v52 = vsub.s32 0, %v3598_v48  ;;  %v809_v54 = vsub.s32 2, %v3598_v48  ;;  %v797_v55 = vld [vmem:[%s3649_s9] sm:$0xf] }
 0x4ea   :  { %1872 = vmatpush1.bf16.msra.mxu1 %v2940_v58  ;;  %1915 = vmatpush1.bf16.msra.mxu0 %v2943_v59  ;;  %v806_v59 = vrot.slane %v797_v55, %v805_v49 }
 0x4eb   :  { %1873 = vmatprep.subr.bf16.mxu1 %v2948_v60  ;;  %1916 = vmatprep.subr.bf16.mxu0 %v2951_v61  ;;  %v814_v60 = vrot.slane %v797_v55, %v813_v51  ;;  %v802_v61 = vrot.slane %v797_v55, %v801_v52 }
 0x4ee   :  { %1874 = vmatpush1.bf16.msra.mxu1 %v2946_v63  ;;  %1917 = vmatpush1.bf16.msra.mxu0 %v2949_v2  ;;  %v810_v63 = vrot.slane %v797_v55, %v809_v54  ;;  %v3068_v55 = vld [vmem:[#allocation10 + $0xc] ss:$16 sps:$4 sm:$0xff]  }
 0x4ef   :  { %1875 = vmatprep.subr.bf16.mxu1 %v2954_v3  ;;  %1918 = vmatprep.subr.bf16.mxu0 %v2957_v4 }
 0x4f2   :  { %1876 = vmatpush1.bf16.msra.mxu1 %v2952_v5  ;;  %1919 = vmatpush1.bf16.msra.mxu0 %v2955_v7 }
 0x4f3   :  { %1877 = vmatprep.subr.bf16.mxu1 %v2960_v8  ;;  %1920 = vmatprep.subr.bf16.mxu0 %v2963_v9 }
 0x4f6   :  { %1878 = vmatpush1.bf16.msra.mxu1 %v2958_v10  ;;  %1921 = vmatpush1.bf16.msra.mxu0 %v2961_v53 }
 0x4f7   :  { %1879 = vmatprep.subr.bf16.mxu1 %v2966_v57  ;;  %1922 = vmatprep.subr.bf16.mxu0 %v2969_v0 }
 0x4fa   :  { %1880 = vmatpush1.bf16.msra.mxu1 %v2964_v12  ;;  %1923 = vmatpush1.bf16.msra.mxu0 %v2967_v62 }
 0x4fb   :  { %1881 = vmatprep.subr.bf16.mxu1 %v2972_v1  ;;  %1924 = vmatprep.subr.bf16.mxu0 %v2975_v38 }
 0x4fe   :  { %1882 = vmatpush1.bf16.msra.mxu1 %v2970_v11  ;;  %1925 = vmatpush1.bf16.msra.mxu0 %v2973_v39 }
 0x4ff   :  { %1883 = vmatprep.subr.bf16.mxu1 %v2978_v44  ;;  %1926 = vmatprep.subr.bf16.mxu0 %v2981_v6 }
 0x502   :  { %1884 = vmatpush2.bf16.msra.mxu1 %v2976_v43  ;;  %1927 = vmatpush2.bf16.msra.mxu0 %v2979_v45 }
 0x503   :  { %1885 = vmatprep.subr.bf16.mxu1 %v2984_v50  ;;  %1928 = vmatprep.subr.bf16.mxu0 %v2987_v14 }
 0x506   :  { %1886 = vmatpush2.bf16.msra.mxu1 %v2982_v16  ;;  %1929 = vmatpush2.bf16.msra.mxu0 %v2985_v15  ;;  %v3024_v15 = vld [vmem:[#allocation10 + $0xe8] ss:$16 sps:$4 sm:$0xff]  }
 0x507   :  { %1887 = vmatprep.subr.bf16.mxu1 %v2990_v13  ;;  %1930 = vmatprep.subr.bf16.mxu0 %v2993_v17  ;;  %v3027_v13 = vld [vmem:[#allocation10 + $0x2e8] ss:$16 sps:$4 sm:$0xff]  }
 0x50a   :  { %1888 = vmatpush2.bf16.msra.mxu1 %v2988_v18  ;;  %1931 = vmatpush2.bf16.msra.mxu0 %v2991_v19  ;;  %v3032_v19 = vld [vmem:[#allocation10 + $0xcc] ss:$16 sps:$4 sm:$0xff]  }
 0x50b   :  { %1889 = vmatprep.subr.bf16.mxu1 %v2996_v21  ;;  %1932 = vmatprep.subr.bf16.mxu0 %v2999_v22  ;;  %v3035_v21 = vld [vmem:[#allocation10 + $0x2cc] ss:$16 sps:$4 sm:$0xff]   ;;  %v3030_v22 = vld [vmem:[#allocation10 + $0xc8] ss:$16 sps:$4 sm:$0xff]  }
 0x50e   :  { %1890 = vmatpush2.bf16.msra.mxu1 %v2994_v23  ;;  %1933 = vmatpush2.bf16.msra.mxu0 %v2997_v25  ;;  %v3033_v23 = vld [vmem:[#allocation10 + $0x2c8] ss:$16 sps:$4 sm:$0xff]   ;;  %v3038_v25 = vld [vmem:[#allocation10 + $0xac] ss:$16 sps:$4 sm:$0xff]  }
 0x50f   :  { %1891 = vmatprep.subr.bf16.mxu1 %v3002_v20  ;;  %1934 = vmatprep.subr.bf16.mxu0 %v3005_v24  ;;  %v3041_v20 = vld [vmem:[#allocation10 + $0x2ac] ss:$16 sps:$4 sm:$0xff]   ;;  %v3036_v24 = vld [vmem:[#allocation10 + $0xa8] ss:$16 sps:$4 sm:$0xff]  }
 0x512   :  { %1892 = vmatpush2.bf16.msra.mxu1 %v3000_v26  ;;  %1935 = vmatpush2.bf16.msra.mxu0 %v3003_v27  ;;  %v3039_v26 = vld [vmem:[#allocation10 + $0x2a8] ss:$16 sps:$4 sm:$0xff]   ;;  %v3044_v27 = vld [vmem:[#allocation10 + $0x8c] ss:$16 sps:$4 sm:$0xff]  }
 0x513   :  { %1893 = vmatprep.subr.bf16.mxu1 %v3008_v28  ;;  %1936 = vmatprep.subr.bf16.mxu0 %v3011_v29  ;;  %v3047_v28 = vld [vmem:[#allocation10 + $0x28c] ss:$16 sps:$4 sm:$0xff]   ;;  %v3042_v29 = vld [vmem:[#allocation10 + $0x88] ss:$16 sps:$4 sm:$0xff]  }
 0x516   :  { %1894 = vmatpush2.bf16.msra.mxu1 %v3006_v30  ;;  %1937 = vmatpush2.bf16.msra.mxu0 %v3009_v31  ;;  %v3045_v30 = vld [vmem:[#allocation10 + $0x288] ss:$16 sps:$4 sm:$0xff]   ;;  %v3050_v31 = vld [vmem:[#allocation10 + $0x6c] ss:$16 sps:$4 sm:$0xff]  }
 0x517   :  { %1895 = vmatprep.subr.bf16.mxu1 %v3014_v32  ;;  %1938 = vmatprep.subr.bf16.mxu0 %v3017_v33  ;;  %v3053_v32 = vld [vmem:[#allocation10 + $0x26c] ss:$16 sps:$4 sm:$0xff]   ;;  %v3048_v33 = vld [vmem:[#allocation10 + $0x68] ss:$16 sps:$4 sm:$0xff]  }
 0x51a   :  { %1896 = vmatpush2.bf16.msra.mxu1 %v3012_v34  ;;  %1939 = vmatpush2.bf16.msra.mxu0 %v3015_v35  ;;  %v3051_v34 = vld [vmem:[#allocation10 + $0x268] ss:$16 sps:$4 sm:$0xff]   ;;  %v3056_v35 = vld [vmem:[#allocation10 + $0x4c] ss:$16 sps:$4 sm:$0xff]  }
 0x51b   :  { %1897 = vmatprep.subr.bf16.mxu1 %v3020_v36  ;;  %1940 = vmatprep.subr.bf16.mxu0 %v3023_v37  ;;  %v3059_v36 = vld [vmem:[#allocation10 + $0x24c] ss:$16 sps:$4 sm:$0xff]   ;;  %v3054_v37 = vld [vmem:[#allocation10 + $0x48] ss:$16 sps:$4 sm:$0xff]  }
 0x51e   :  { %1898 = vmatpush2.bf16.msra.mxu1 %v3018_v40  ;;  %1941 = vmatpush2.bf16.msra.mxu0 %v3021_v41  ;;  %v3057_v40 = vld [vmem:[#allocation10 + $0x248] ss:$16 sps:$4 sm:$0xff]   ;;  %v3062_v41 = vld [vmem:[#allocation10 + $0x2c] ss:$16 sps:$4 sm:$0xff]  }
 0x51f   :  { %1953 = vmatprep.subr.bf16.mxu1 %v3026_v42  ;;  %1996 = vmatprep.subr.bf16.mxu0 %v3029_v46  ;;  %v3065_v42 = vld [vmem:[#allocation10 + $0x22c] ss:$16 sps:$4 sm:$0xff]   ;;  %v3060_v46 = vld [vmem:[#allocation10 + $0x28] ss:$16 sps:$4 sm:$0xff]  }
 0x5a1   :  { %v1013_v56 = vpop.f32.mrf.mxu1  ;;  %v1056_v58 = vpop.f32.mrf.mxu0 }
 0x5a2   :  { %v1014_v53 = vadd.f32 %v1013_v56, %v802_v61  ;;  %v1057_v57 = vadd.f32 %v1056_v58, %v810_v63  ;;  %v3071_v56 = vld [vmem:[#allocation10 + $0x20c] ss:$16 sps:$4 sm:$0xff]   ;;  %v3066_v58 = vld [vmem:[#allocation10 + $0x8] ss:$16 sps:$4 sm:$0xff]  }
 0x5a3   :  { %v1015_v2 = vpop.f32.mrf.mxu1  ;;  %v1058_v3 = vpop.f32.mrf.mxu0 }
 0x5a4   :  { %v1016_v7 = vadd.f32 %v1015_v2, %v806_v59  ;;  %v1059_v8 = vadd.f32 %v1058_v3, %v814_v60  ;;  %v1065_v45 = vmax.f32 %v1014_v53, 0.0  ;;  %v1067_v50 = vmax.f32 %v1057_v57, 0.0  ;;  %v3075_v2 = vld [vmem:[#allocation10 + $0x3e8] ss:$16 sps:$4 sm:$0xff]   ;;  %v3080_v3 = vld [vmem:[#allocation10 + $0x1cc] ss:$16 sps:$4 sm:$0xff]  }
 0x5a5   :  { %v1017_v4 = vpop.f32.mrf.mxu1  ;;  %v1060_v5 = vpop.f32.mrf.mxu0  ;;  %v3087_v53 = vld [vmem:[#allocation10 + $0x3a8] ss:$16 sps:$4 sm:$0xff]   ;;  %v3092_v57 = vld [vmem:[#allocation10 + $0x18c] ss:$16 sps:$4 sm:$0xff]  }
 0x5a6   :  { %v1018_v9 = vadd.f32 %v1017_v4, %v802_v61  ;;  %v1061_v10 = vadd.f32 %v1060_v5, %v810_v63  ;;  %v1066_v39 = vmax.f32 %v1016_v7, 0.0  ;;  %v1068_v44 = vmax.f32 %v1059_v8, 0.0  ;;  %v3077_v61 = vld [vmem:[#allocation10 + $0x3ec] ss:$16 sps:$4 sm:$0xff]   ;;  %v3072_v63 = vld [vmem:[#allocation10 + $0x1e8] ss:$16 sps:$4 sm:$0xff]  }
 0x5a7   :  { %v1019_v0 = vpop.f32.mrf.mxu1  ;;  %v1062_v12 = vpop.f32.mrf.mxu0  ;;  %v3083_v4 = vld [vmem:[#allocation10 + $0x3cc] ss:$16 sps:$4 sm:$0xff]   ;;  %v3078_v5 = vld [vmem:[#allocation10 + $0x1c8] ss:$16 sps:$4 sm:$0xff]  }
 0x5a8   :  { %v1020_v62 = vadd.f32 %v1019_v0, %v806_v59  ;;  %v1063_v1 = vadd.f32 %v1062_v12, %v814_v60  ;;  %v1069_v38 = vmax.f32 %v1018_v9, 0.0  ;;  %v1071_v11 = vmax.f32 %v1061_v10, 0.0  ;;  %v3069_v59 = vld [vmem:[#allocation10 + $0x208] ss:$16 sps:$4 sm:$0xff]   ;;  %v3074_v60 = vld [vmem:[#allocation10 + $0x1ec] ss:$16 sps:$4 sm:$0xff]  }
 0x5a9   :  { %v3081_v7 = vld [vmem:[#allocation10 + $0x3c8] ss:$16 sps:$4 sm:$0xff]   ;;  %v3086_v8 = vld [vmem:[#allocation10 + $0x1ac] ss:$16 sps:$4 sm:$0xff]  }
 0x5aa   :  { %v1070_v6 = vmax.f32 %v1020_v62, 0.0  ;;  %v1072_v43 = vmax.f32 %v1063_v1, 0.0  ;;  %v3615_v17 = vpack.c.bf16 %v1069_v38, %v1065_v45  ;;  %v3617_v18 = vpack.c.bf16 %v1071_v11, %v1067_v50  ;;  %v3089_v9 = vld [vmem:[#allocation10 + $0x3ac] ss:$16 sps:$4 sm:$0xff]   ;;  %v3084_v10 = vld [vmem:[#allocation10 + $0x1a8] ss:$16 sps:$4 sm:$0xff]  }
 0x5ab   :  { %v3095_v0 = vld [vmem:[#allocation10 + $0x38c] ss:$16 sps:$4 sm:$0xff]   ;;  %v3090_v12 = vld [vmem:[#allocation10 + $0x188] ss:$16 sps:$4 sm:$0xff]  }
 0x5ac   :  { %v1074_v14 = vpack.c.bf16 %v1070_v6, %v1066_v39  ;;  %v1076_v16 = vpack.c.bf16 %v1072_v43, %v1068_v44  ;;  %v3093_v62 = vld [vmem:[#allocation10 + $0x388] ss:$16 sps:$4 sm:$0xff]   ;;  %v3098_v1 = vld [vmem:[#allocation10 + $0x16c] ss:$16 sps:$4 sm:$0xff]  }
 0x5ad   :  { %v3101_v38 = vld [vmem:[#allocation10 + $0x36c] ss:$16 sps:$4 sm:$0xff]   ;;  %v3096_v11 = vld [vmem:[#allocation10 + $0x168] ss:$16 sps:$4 sm:$0xff]  }
 0x5ae   :  { %1899 = vmatprep.mubr.bf16.mxu1 %v1074_v14  ;;  %1942 = vmatprep.mubr.bf16.mxu0 %v1076_v16  ;;  %v3099_v39 = vld [vmem:[#allocation10 + $0x368] ss:$16 sps:$4 sm:$0xff]   ;;  %v3104_v44 = vld [vmem:[#allocation10 + $0x14c] ss:$16 sps:$4 sm:$0xff]  }
 0x5af   :  { %1900 = vmatmul.mubr.bf16.vlgmr.msra.gmra.mxu1 %v3615_v17  ;;  %1943 = vmatmul.mubr.bf16.vlgmr.msra.gmra.mxu0 %v3617_v18  ;;  %v3107_v6 = vld [vmem:[#allocation10 + $0x34c] ss:$16 sps:$4 sm:$0xff]   ;;  %v3102_v43 = vld [vmem:[#allocation10 + $0x148] ss:$16 sps:$4 sm:$0xff]  }
 0x5b0   :  { %1954 = vmatpush1.bf16.msra.mxu1 %v3024_v15  ;;  %1997 = vmatpush1.bf16.msra.mxu0 %v3027_v13  ;;  %v3105_v45 = vld [vmem:[#allocation10 + $0x348] ss:$16 sps:$4 sm:$0xff]   ;;  %v3110_v50 = vld [vmem:[#allocation10 + $0x12c] ss:$16 sps:$4 sm:$0xff]  }
 0x5b1   :  { %1985 = vmatprep.mubr.bf16.mxu1 %v1074_v14  ;;  %2028 = vmatprep.mubr.bf16.mxu0 %v1076_v16  ;;  %v3113_v14 = vld [vmem:[#allocation10 + $0x32c] ss:$16 sps:$4 sm:$0xff]   ;;  %v3108_v16 = vld [vmem:[#allocation10 + $0x128] ss:$16 sps:$4 sm:$0xff]  }
 0x5b2   :  { %1955 = vmatprep.subr.bf16.mxu1 %v3032_v19  ;;  %1998 = vmatprep.subr.bf16.mxu0 %v3035_v21  ;;  %v3111_v15 = vld [vmem:[#allocation10 + $0x328] ss:$16 sps:$4 sm:$0xff]   ;;  %v3116_v13 = vld [vmem:[#allocation10 + $0x10c] ss:$16 sps:$4 sm:$0xff]  }
 0x5b3   :  { %v3119_v19 = vld [vmem:[#allocation10 + $0x30c] ss:$16 sps:$4 sm:$0xff]   ;;  %v3114_v21 = vld [vmem:[#allocation10 + $0x108] ss:$16 sps:$4 sm:$0xff]  }
 0x5b4   :  { %1956 = vmatpush1.bf16.msra.mxu1 %v3030_v22  ;;  %1999 = vmatpush1.bf16.msra.mxu0 %v3033_v23  ;;  %v3117_v22 = vld [vmem:[#allocation10 + $0x308] ss:$16 sps:$4 sm:$0xff]  }
 0x5b5   :  { %1957 = vmatprep.subr.bf16.mxu1 %v3038_v25  ;;  %2000 = vmatprep.subr.bf16.mxu0 %v3041_v20  ;;  %v3120_v23 = vld [vmem:[#allocation11 + $0x78] sm:$0xff]   ;;  %v3122_v20 = vld [vmem:[#allocation11 + $0x70] sm:$0xff]  }
 0x5b6   :  { %v3121_v25 = vld [vmem:[#allocation11 + $0x38] sm:$0xff]  }
 0x5b8   :  { %1958 = vmatpush1.bf16.msra.mxu1 %v3036_v24  ;;  %2001 = vmatpush1.bf16.msra.mxu0 %v3039_v26  ;;  %v3123_v24 = vld [vmem:[#allocation11 + $0x30] sm:$0xff]   ;;  %v3124_v26 = vld [vmem:[#allocation11 + $0x68] sm:$0xff]  }
 0x5b9   :  { %1959 = vmatprep.subr.bf16.mxu1 %v3044_v27  ;;  %2002 = vmatprep.subr.bf16.mxu0 %v3047_v28  ;;  %v3125_v27 = vld [vmem:[#allocation11 + $0x28] sm:$0xff]   ;;  %v3126_v28 = vld [vmem:[#allocation11 + $0x60] sm:$0xff]  }
 0x5bc   :  { %1960 = vmatpush1.bf16.msra.mxu1 %v3042_v29  ;;  %2003 = vmatpush1.bf16.msra.mxu0 %v3045_v30  ;;  %v3127_v29 = vld [vmem:[#allocation11 + $0x20] sm:$0xff]   ;;  %v3128_v30 = vld [vmem:[#allocation11 + $0x58] sm:$0xff]  }
 0x5bd   :  { %1961 = vmatprep.subr.bf16.mxu1 %v3050_v31  ;;  %2004 = vmatprep.subr.bf16.mxu0 %v3053_v32  ;;  %v3129_v31 = vld [vmem:[#allocation11 + $0x18] sm:$0xff]   ;;  %v3130_v32 = vld [vmem:[#allocation11 + $0x50] sm:$0xff]  }
 0x5c0   :  { %1962 = vmatpush1.bf16.msra.mxu1 %v3048_v33  ;;  %2005 = vmatpush1.bf16.msra.mxu0 %v3051_v34  ;;  %v3136_v33 = vld [vmem:[#allocation11 + $0xf8] sm:$0xff]   ;;  %v3138_v34 = vld [vmem:[#allocation11 + $0xf0] sm:$0xff]  }
 0x5c1   :  { %1963 = vmatprep.subr.bf16.mxu1 %v3056_v35  ;;  %2006 = vmatprep.subr.bf16.mxu0 %v3059_v36  ;;  %v3132_v35 = vld [vmem:[#allocation11 + $0x48] sm:$0xff]   ;;  %v3139_v36 = vld [vmem:[#allocation11 + $0xb0] sm:$0xff]  }
 0x5c4   :  { %1964 = vmatpush1.bf16.msra.mxu1 %v3054_v37  ;;  %2007 = vmatpush1.bf16.msra.mxu0 %v3057_v40  ;;  %v3140_v37 = vld [vmem:[#allocation11 + $0xe8] sm:$0xff]  }
 0x5c5   :  { %1965 = vmatprep.subr.bf16.mxu1 %v3062_v41  ;;  %2008 = vmatprep.subr.bf16.mxu0 %v3065_v42  ;;  %v3133_v40 = vld [vmem:[#allocation11 + $0x8] sm:$0xff]   ;;  %v3134_v41 = vld [vmem:[#allocation11 + $0x40] sm:$0xff]  }
 0x5c6   :  { %v3141_v42 = vld [vmem:[#allocation11 + $0xa8] sm:$0xff]  }
 0x5c8   :  { %1966 = vmatpush1.bf16.msra.mxu1 %v3060_v46  ;;  %2009 = vmatpush1.bf16.msra.mxu0 %v3063_v47  ;;  %v3142_v46 = vld [vmem:[#allocation11 + $0xe0] sm:$0xff]  }
 0x5c9   :  { %1967 = vmatprep.subr.bf16.mxu1 %v3068_v55  ;;  %2010 = vmatprep.subr.bf16.mxu0 %v3071_v56  ;;  %v3135_v47 = vld [vmem:[#allocation11] sm:$0xff]   ;;  %v3144_v56 = vld [vmem:[#allocation11 + $0xd8] sm:$0xff]  }
 0x5ca   :  { %v3143_v55 = vld [vmem:[#allocation11 + $0xa0] sm:$0xff]  }
 0x5cc   :  { %1968 = vmatpush1.bf16.msra.mxu1 %v3066_v58  ;;  %2011 = vmatpush1.bf16.msra.mxu0 %v3069_v59  ;;  %v3145_v58 = vld [vmem:[#allocation11 + $0x98] sm:$0xff]   ;;  %v3146_v59 = vld [vmem:[#allocation11 + $0xd0] sm:$0xff]  }
 0x5cd   :  { %1969 = vmatprep.subr.bf16.mxu1 %v3074_v60  ;;  %2012 = vmatprep.subr.bf16.mxu0 %v3077_v61  ;;  %v3147_v60 = vld [vmem:[#allocation11 + $0x90] sm:$0xff]   ;;  %v3148_v61 = vld [vmem:[#allocation11 + $0xc8] sm:$0xff]  }
 0x5d0   :  { %1970 = vmatpush2.bf16.msra.mxu1 %v3072_v63  ;;  %2013 = vmatpush2.bf16.msra.mxu0 %v3075_v2  ;;  %v3149_v63 = vld [vmem:[#allocation11 + $0x88] sm:$0xff]   ;;  %v3150_v2 = vld [vmem:[#allocation11 + $0xc0] sm:$0xff]  }
 0x5d1   :  { %1971 = vmatprep.subr.bf16.mxu1 %v3080_v3  ;;  %2014 = vmatprep.subr.bf16.mxu0 %v3083_v4  ;;  %v3151_v3 = vld [vmem:[#allocation11 + $0x80] sm:$0xff]   ;;  %v1205_v4 = vld [vmem:[%s3651_s11] sm:$0xf] }
 0x5d4   :  { %1972 = vmatpush2.bf16.msra.mxu1 %v3078_v5  ;;  %2015 = vmatpush2.bf16.msra.mxu0 %v3081_v7  ;;  %v1214_v5 = vrot.slane %v1205_v4, %v805_v49  ;;  %v1210_v7 = vrot.slane %v1205_v4, %v801_v52 }
 0x5d5   :  { %1973 = vmatprep.subr.bf16.mxu1 %v3086_v8  ;;  %2016 = vmatprep.subr.bf16.mxu0 %v3089_v9 }
 0x5d8   :  { %1974 = vmatpush2.bf16.msra.mxu1 %v3084_v10  ;;  %2017 = vmatpush2.bf16.msra.mxu0 %v3087_v53 }
 0x5d9   :  { %1975 = vmatprep.subr.bf16.mxu1 %v3092_v57  ;;  %2018 = vmatprep.subr.bf16.mxu0 %v3095_v0 }
 0x5dc   :  { %1976 = vmatpush2.bf16.msra.mxu1 %v3090_v12  ;;  %2019 = vmatpush2.bf16.msra.mxu0 %v3093_v62 }
 0x5dd   :  { %1977 = vmatprep.subr.bf16.mxu1 %v3098_v1  ;;  %2020 = vmatprep.subr.bf16.mxu0 %v3101_v38 }
 0x5e0   :  { %1978 = vmatpush2.bf16.msra.mxu1 %v3096_v11  ;;  %2021 = vmatpush2.bf16.msra.mxu0 %v3099_v39 }
 0x5e1   :  { %1979 = vmatprep.subr.bf16.mxu1 %v3104_v44  ;;  %2022 = vmatprep.subr.bf16.mxu0 %v3107_v6 }
 0x5e4   :  { %1980 = vmatpush2.bf16.msra.mxu1 %v3102_v43  ;;  %2023 = vmatpush2.bf16.msra.mxu0 %v3105_v45 }
 0x5e5   :  { %1981 = vmatprep.subr.bf16.mxu1 %v3110_v50  ;;  %2024 = vmatprep.subr.bf16.mxu0 %v3113_v14 }
 0x5e8   :  { %1982 = vmatpush2.bf16.msra.mxu1 %v3108_v16  ;;  %2025 = vmatpush2.bf16.msra.mxu0 %v3111_v15 }
 0x5e9   :  { %1983 = vmatprep.subr.bf16.mxu1 %v3116_v13  ;;  %2026 = vmatprep.subr.bf16.mxu0 %v3119_v19  ;;  %v1222_v13 = vrot.slane %v1205_v4, %v813_v51  ;;  %v1218_v19 = vrot.slane %v1205_v4, %v809_v54 }
 0x5ec   :  { %1984 = vmatpush2.bf16.msra.mxu1 %v3114_v21  ;;  %2027 = vmatpush2.bf16.msra.mxu0 %v3117_v22 }
 0x5ed   :  { %2703 = vmatprep.subr.bf16.mxu1 %v3120_v23  ;;  %2725 = vmatprep.subr.bf16.mxu0 %v3136_v33 }
 0x5ef   :  { %1986 = vmatmul.mubr.bf16.vlgmr.msra.gmra.mxu1 %v3615_v17  ;;  %2029 = vmatmul.mubr.bf16.vlgmr.msra.gmra.mxu0 %v3617_v18  ;;  %v3137_v17 = vld [vmem:[#allocation11 + $0xb8] sm:$0xff]   ;;  %v3131_v18 = vld [vmem:[#allocation11 + $0x10] sm:$0xff]  }
 0x5f0   :  { %2704 = vmatpush3.bf16.msra.mxu1 %v3121_v25  ;;  %2726 = vmatpush3.bf16.msra.mxu0 %v3137_v17 }
 0x5f1   :  { %2705 = vmatprep.subr.bf16.mxu1 %v3122_v20  ;;  %2727 = vmatprep.subr.bf16.mxu0 %v3138_v34 }
 0x5f4   :  { %2706 = vmatpush3.bf16.msra.mxu1 %v3123_v24  ;;  %2728 = vmatpush3.bf16.msra.mxu0 %v3139_v36 }
 0x5f5   :  { %2707 = vmatprep.subr.bf16.mxu1 %v3124_v26  ;;  %2729 = vmatprep.subr.bf16.mxu0 %v3140_v37 }
 0x5f8   :  { %2708 = vmatpush3.bf16.msra.mxu1 %v3125_v27  ;;  %2730 = vmatpush3.bf16.msra.mxu0 %v3141_v42 }
 0x5f9   :  { %2709 = vmatprep.subr.bf16.mxu1 %v3126_v28  ;;  %2731 = vmatprep.subr.bf16.mxu0 %v3142_v46  ;;  %v2606_v46 = vld [vmem:[%s3653_s13] ss:$0 sm:$0xff] }
 0x5fc   :  { %2710 = vmatpush3.bf16.msra.mxu1 %v3127_v29  ;;  %2732 = vmatpush3.bf16.msra.mxu0 %v3143_v55 }
 0x5fd   :  { %2711 = vmatprep.subr.bf16.mxu1 %v3128_v30  ;;  %2733 = vmatprep.subr.bf16.mxu0 %v3144_v56 }
 0x600   :  { %2712 = vmatpush3.bf16.msra.mxu1 %v3129_v31  ;;  %2734 = vmatpush3.bf16.msra.mxu0 %v3145_v58 }
 0x601   :  { %2713 = vmatprep.subr.bf16.mxu1 %v3130_v32  ;;  %2735 = vmatprep.subr.bf16.mxu0 %v3146_v59 }
 0x604   :  { %2714 = vmatpush3.bf16.msra.mxu1 %v3131_v18  ;;  %2736 = vmatpush3.bf16.msra.mxu0 %v3147_v60 }
 0x605   :  { %2715 = vmatprep.subr.bf16.mxu1 %v3132_v35  ;;  %2737 = vmatprep.subr.bf16.mxu0 %v3148_v61 }
 0x608   :  { %2716 = vmatpush3.bf16.msra.mxu1 %v3133_v40  ;;  %2738 = vmatpush3.bf16.msra.mxu0 %v3149_v63 }
 0x609   :  { %2717 = vmatprep.subr.bf16.mxu1 %v3134_v41  ;;  %2739 = vmatprep.subr.bf16.mxu0 %v3150_v2 }
 0x60c   :  { %2718 = vmatpush3.bf16.msra.mxu1 %v3135_v47  ;;  %2740 = vmatpush3.bf16.msra.mxu0 %v3151_v3 }
 0x66f   :  { %v1901_v8 = vpop.f32.mrf.mxu1  ;;  %v1944_v9 = vpop.f32.mrf.mxu0 }
 0x670   :  { %v1902_v0 = vadd.f32 %v1901_v8, %v1210_v7 }
 0x671   :  { %v1903_v10 = vpop.f32.mrf.mxu1  ;;  %v1946_v53 = vpop.f32.mrf.mxu0 }
 0x672   :  { %v1904_v57 = vadd.f32 %v1903_v10, %v1214_v5  ;;  %v1945_v6 = vadd.f32 %v1944_v9, %v1902_v0 }
 0x673   :  { %v1905_v12 = vpop.f32.mrf.mxu1  ;;  %v1948_v62 = vpop.f32.mrf.mxu0 }
 0x674   :  { %v1906_v1 = vadd.f32 %v1905_v12, %v1210_v7  ;;  %v1947_v11 = vadd.f32 %v1946_v53, %v1904_v57  ;;  %v2039_v52 = vmax.f32 %v1945_v6, 0.0 }
 0x675   :  { %v1907_v38 = vpop.f32.mrf.mxu1  ;;  %v1950_v43 = vpop.f32.mrf.mxu0 }
 0x676   :  { %v1949_v39 = vadd.f32 %v1948_v62, %v1906_v1  ;;  %v1908_v44 = vadd.f32 %v1907_v38, %v1214_v5  ;;  %v2040_v50 = vmax.f32 %v1947_v11, 0.0 }
 0x678   :  { %v1951_v45 = vadd.f32 %v1950_v43, %v1908_v44  ;;  %v2043_v49 = vmax.f32 %v1949_v39, 0.0 }
 0x67a   :  { %v2044_v14 = vmax.f32 %v1951_v45, 0.0  ;;  %v2047_v15 = vpack.c.bf16 %v2043_v49, %v2039_v52 }
 0x67c   :  { %v2048_v16 = vpack.c.bf16 %v2044_v14, %v2040_v50 }
 0x67e   :  { %2346 = vmatprep.mubr.bf16.mxu1 %v2048_v16 }
 0x67f   :  { %2347 = vmatmul.mubr.bf16.vlgmr.msra.gmra.mxu1 %v2047_v15 }
 0x6af   :  { %v1987_v21 = vpop.f32.mrf.mxu1  ;;  %v2030_v22 = vpop.f32.mrf.mxu0 }
 0x6b0   :  { %v1988_v24 = vadd.f32 %v1987_v21, %v1218_v19 }
 0x6b1   :  { %v1989_v23 = vpop.f32.mrf.mxu1  ;;  %v2032_v25 = vpop.f32.mrf.mxu0 }
 0x6b2   :  { %v1990_v20 = vadd.f32 %v1989_v23, %v1222_v13  ;;  %v2031_v33 = vadd.f32 %v2030_v22, %v1988_v24 }
 0x6b3   :  { %v1991_v26 = vpop.f32.mrf.mxu1  ;;  %v2034_v27 = vpop.f32.mrf.mxu0 }
 0x6b4   :  { %v1992_v28 = vadd.f32 %v1991_v26, %v1218_v19  ;;  %v2033_v30 = vadd.f32 %v2032_v25, %v1990_v20  ;;  %v2041_v54 = vmax.f32 %v2031_v33, 0.0 }
 0x6b5   :  { %v1993_v29 = vpop.f32.mrf.mxu1  ;;  %v2036_v17 = vpop.f32.mrf.mxu0 }
 0x6b6   :  { %v2035_v31 = vadd.f32 %v2034_v27, %v1992_v28  ;;  %v1994_v32 = vadd.f32 %v1993_v29, %v1222_v13  ;;  %v2042_v18 = vmax.f32 %v2033_v30, 0.0 }
 0x6b8   :  { %v2037_v34 = vadd.f32 %v2036_v17, %v1994_v32  ;;  %v2045_v51 = vmax.f32 %v2035_v31, 0.0 }
 0x6ba   :  { %v2046_v48 = vmax.f32 %v2037_v34, 0.0  ;;  %v2049_v36 = vpack.c.bf16 %v2045_v51, %v2041_v54 }
 0x6bc   :  { %v2050_v35 = vpack.c.bf16 %v2046_v48, %v2042_v18 }
 0x6be   :  { %2387 = vmatprep.mubr.bf16.mxu0 %v2050_v35 }
 0x6bf   :  { %2388 = vmatmul.mubr.bf16.vlgmr.msra.gmra.mxu0 %v2049_v36 }
 0x73f   :  { %v2719_v37 = vpop.f32.mrf.mxu1 }
 0x741   :  { %v2720_v40 = vpop.f32.mrf.mxu1 }
 0x742   :  { %v2721_v42 = vadd.f32 %v2720_v40, %v2719_v37 }
 0x743   :  { %v2722_v41 = vpop.f32.mrf.mxu1 }
 0x744   :  { %v2349_v58 = vadd.f32 %v2721_v42, %v2606_v46 }
 0x745   :  { %v2723_v47 = vpop.f32.mrf.mxu1 }
 0x746   :  { %v2724_v59 = vadd.f32 %v2723_v47, %v2722_v41 }
 0x748   :  { %v2352_v3 = vadd.f32 %v2724_v59, %v2606_v46 }
 0x77f   :  { %v2741_v55 = vpop.f32.mrf.mxu0 }
 0x781   :  { %v2742_v56 = vpop.f32.mrf.mxu0 }
 0x782   :  { %v2743_v60 = vadd.f32 %v2742_v56, %v2741_v55 }
 0x783   :  { %v2744_v61 = vpop.f32.mrf.mxu0 }
 0x784   :  { %v2390_v63 = vadd.f32 %v2743_v60, %v2349_v58 }
 0x785   :  { %v2745_v2 = vpop.f32.mrf.mxu0 }
 0x786   :  { %2396 = vst [vmem:[#allocation13] sm:$0xff] %v2390_v63  ;;  %v2746_v4 = vadd.f32 %v2745_v2, %v2744_v61 }
 0x788   :  { %v2393_v5 = vadd.f32 %v2746_v4, %v2352_v3 }
 0x78a   :  { %2397 = vst [vmem:[#allocation13 + $0x8] sm:$0xff] %v2393_v5 }
 0x78b   :  { %3291 = shalt.err (!%p3288_p6)
}
 0x78c   :  { %s3324_s13 = smov 128   ;;  %s3325_s27 = smov 8  }
 0x78d   :  { %2409 = dma.vmem_to_hbm [thread:$0]  %s2404_s22, 256, %s3654_s14, [#allocation4], %s3324_s13, %s3324_s13, %s3325_s27  }
 0x78e   :  { %3308 = dma.done.wait [#allocation4], 256  }
 0x78f   :  { %3309 = vsyncadd [#allocation4], 4294967040 }
 0x790   :  { %2413 = vsyncpa [#allocation3], 1 }
 0x791   :  { %2414 = vsyncpa [#allocation6], 1 }
 0x792   :  { %2415 = vsyncpa [#allocation9], 1 }
 0x793   :  { %2416 = vsyncpa [#allocation12], 1 }
 0x794   :  { %2417 = vsyncpa [#allocation4], 1 }

</bundles_post_ra>
